<compile_context>
chip_gen: v7x
topology: tpu7x:2x2x1
jax: 0.10.0
libtpu: 0.0.40
codegen_flags: <defaults>
</compile_context>

<pallas_src>
import functools

import jax
import jax.numpy as jnp
import numpy as np
from jax import lax
from jax.experimental import pallas as pl
from jax.experimental.pallas import tpu as pltpu


def _rup(x, m):
    return (x + m - 1) // m * m


def _residual_kernel(x_ref, mask_ref, w1_ref, b1_ref, w2_ref, b2_ref, *rest,
                     stride, Wf, Lfr, Lpad, Cin_p, has_proj, B_blk):
    """Fused residual block for B_blk images.

    x_ref   : (B_blk, P*Cin_p, Lx) bf16  polyphase, channel-padded, zero-padded,
              spatially flattened input, shifted right by Wf+1 lanes
    mask_ref: (1, Lfr) f32   1.0 on the interior of the conv2-input padded layout
    w1_ref  : (9, Cout_p, Cin_p)  bf16 conv1 taps, bn1 scale folded
    b1_ref  : (Cout_p, 1) f32 bn1 bias
    w2_ref  : (9, Cout_p, Cout_p) bf16 conv2 taps, bn2 scale folded
    b2_ref  : (Cout_p, 1) f32 bn2 bias
    [ws_ref : (Cout_p, Cin_p) bf16, bs_ref: (Cout_p, 1) f32]  projection skip
    o_ref   : (B_blk, Cout_p, Lpad) f32; in-row pad columns / lanes >= L are garbage
    """
    if has_proj:
        ws_ref, bs_ref, o_ref = rest
        ws = ws_ref[...]
        bs = bs_ref[...]
    else:
        (o_ref,) = rest

    s = stride
    mask = mask_ref[...]                      # (1, Lfr) f32
    b1 = b1_ref[...]                          # (Cout_p, 1) f32
    b2 = b2_ref[...]
    w1 = [w1_ref[t] for t in range(9)]        # bf16 per-tap weights (tiny)
    w2 = [w2_ref[t] for t in range(9)]

    for b in range(B_blk):                    # static unroll; B_blk <= ceil(N/2)
        xb = x_ref[b]                         # (P*Cin_p, Lx) bf16

        # ---- conv1 (3x3, stride s via polyphase channel blocks) + bn1 + relu.
        # Output lane p lives directly in conv2's zero-padded flat layout
        # (padded row p//Wf, col p%Wf); mask zeroes the padding ring.
        acc1 = None
        for dy in range(3):
            for dx in range(3):
                ph = (dy % s) * s + (dx % s)
                toff = (dy // s) * Wf + (dx // s)
                xt = xb[ph * Cin_p:(ph + 1) * Cin_p, toff:toff + Lfr]
                d = jnp.dot(w1[dy * 3 + dx], xt,
                            preferred_element_type=jnp.float32)
                acc1 = d if acc1 is None else acc1 + d
        r1 = jnp.maximum(acc1 + b1, 0.0) * mask          # f32 (Cout_p, Lfr)
        r1b = r1.astype(jnp.bfloat16)                    # bf16 MXU operand

        # ---- conv2 (3x3, stride 1, pad 1) + bn2 (scale folded) --------------
        acc2 = None
        for dy in range(3):
            for dx in range(3):
                toff = dy * Wf + dx
                d = jnp.dot(w2[dy * 3 + dx], r1b[:, toff:toff + Lpad],
                            preferred_element_type=jnp.float32)
                acc2 = d if acc2 is None else acc2 + d
        y2 = acc2 + b2                                   # f32 (Cout_p, Lpad)

        # ---- skip path (1x1 strided conv + BN, or identity) -----------------
        sph = (1 % s) * s + (1 % s)
        soff = (Wf + 1) * (1 + 1 // s)
        sk_in = xb[sph * Cin_p:(sph + 1) * Cin_p, soff:soff + Lpad]
        if has_proj:
            sk = jnp.dot(ws, sk_in, preferred_element_type=jnp.float32) + bs
        else:
            sk = sk_in.astype(jnp.float32)               # Cin_p == Cout_p

        o_ref[b] = jnp.maximum(y2 + sk, 0.0).astype(o_ref.dtype)


def _fold_bn(gamma, beta, mean, var, eps=1e-5):
    scale = gamma / jnp.sqrt(var + eps)
    bias = beta - mean * scale
    return scale, bias


def _tapify(w_oihw, scale, cout_p, cin_p):
    # (Cout, Cin, 3, 3) OIHW -> (9, Cout_p, Cin_p) per-tap weights, BN scale folded.
    co, ci = w_oihw.shape[0], w_oihw.shape[1]
    w = (w_oihw * scale[:, None, None, None]).transpose(2, 3, 0, 1).reshape(9, co, ci)
    w = jnp.pad(w, ((0, 0), (0, cout_p - co), (0, cin_p - ci)))
    return w.astype(jnp.bfloat16)


def residual_forward(x, conv1_w, bn1, conv2_w, bn2, skip_w=None, skip_bn=None,
                     stride=1, eps=1e-5):
    """x: (N, Cin, H, W) NCHW f32; conv weights OIHW (PyTorch); bn = (g, b, mean, var)."""
    N, Cin, H, W = x.shape
    Cout = conv1_w.shape[0]
    s = stride
    P = s * s
    has_proj = skip_w is not None
    if not has_proj:
        assert s == 1 and Cin == Cout, "identity skip requires stride==1 and inp_dim==out_dim"

    Ho = (H - 1) // s + 1
    Wo = (W - 1) // s + 1
    Wf = Wo + 2                           # flat row width incl. 2 pad columns
    L = Ho * Wf                           # valid output lane count (pre lane-pad)
    Lpad = _rup(L, 128)                   # lane-aligned conv2 output length
    Lfr = _rup(2 * Wf + 2 + Lpad, 128)    # lane-aligned conv1 output (padded layout)
    max_toff = (2 // s) * Wf + (2 // s)
    Lu = max_toff + Lfr - (Wf + 1)        # unshifted per-phase flat length needed
    Hf = -(-Lu // Wf)                     # phase image height
    Lx = _rup(Wf + 1 + Hf * Wf, 128)      # lane-aligned shifted flat input length

    Cin_p = _rup(Cin, 8)
    Cout_p = _rup(Cout, 8)

    # ---- glue (plain JAX): BN folding, per-tap weight layout, channel pad ----
    sc1, bb1 = _fold_bn(*bn1, eps=eps)
    sc2, bb2 = _fold_bn(*bn2, eps=eps)
    w1t = _tapify(conv1_w, sc1, Cout_p, Cin_p)
    w2t = _tapify(conv2_w, sc2, Cout_p, Cout_p)
    b1 = jnp.pad(bb1, (0, Cout_p - Cout)).reshape(Cout_p, 1).astype(jnp.float32)
    b2 = jnp.pad(bb2, (0, Cout_p - Cout)).reshape(Cout_p, 1).astype(jnp.float32)
    if has_proj:
        scs, bbs = _fold_bn(*skip_bn, eps=eps)
        wst = jnp.pad(skip_w[:, :, 0, 0] * scs[:, None],
                      ((0, Cout_p - Cout), (0, Cin_p - Cin))).astype(jnp.bfloat16)
        bs = jnp.pad(bbs, (0, Cout_p - Cout)).reshape(Cout_p, 1).astype(jnp.float32)
    else:
        wst, bs = None, None

    # ---- polyphase split, channel pad, flatten, shift by Wf+1, lane pad ------
    xb16 = x.astype(jnp.bfloat16)
    xp = jnp.pad(xb16, ((0, 0), (0, Cin_p - Cin),
                        (1, s * Hf - H - 1), (1, s * Wf - W - 1)))
    phases = [xp[:, :, py::s, px::s] for py in range(s) for px in range(s)]
    xph = jnp.stack(phases, axis=1).reshape(N, P * Cin_p, Hf * Wf)
    xflat = jnp.pad(xph, ((0, 0), (0, 0), (Wf + 1, Lx - (Wf + 1) - Hf * Wf)))

    # batch blocking: keep >= 2 grid steps (v7x two TensorCores) while
    # amortizing per-step pipeline overhead on v5e/v6e.
    B_blk = max(1, -(-N // 2))
    G = -(-N // B_blk)
    N_pad = G * B_blk
    if N_pad > N:
        xflat = jnp.pad(xflat, ((0, N_pad - N), (0, 0), (0, 0)))

    # interior mask of the conv2-input padded layout (static, built once).
    pidx = np.arange(Lfr)
    rr, cc = pidx // Wf, pidx % Wf
    mask1 = jnp.asarray(((rr >= 1) & (rr <= Ho) & (cc >= 1) & (cc <= Wo))
                        .astype(np.float32)).reshape(1, Lfr)

    kernel = functools.partial(_residual_kernel, stride=s, Wf=Wf, Lfr=Lfr,
                               Lpad=Lpad, Cin_p=Cin_p, has_proj=has_proj,
                               B_blk=B_blk)
    in_specs = [
        pl.BlockSpec((B_blk, P * Cin_p, Lx), lambda n: (n, 0, 0)),
        pl.BlockSpec((1, Lfr), lambda n: (0, 0)),
        pl.BlockSpec((9, Cout_p, Cin_p), lambda n: (0, 0, 0)),
        pl.BlockSpec((Cout_p, 1), lambda n: (0, 0)),
        pl.BlockSpec((9, Cout_p, Cout_p), lambda n: (0, 0, 0)),
        pl.BlockSpec((Cout_p, 1), lambda n: (0, 0)),
    ]
    inputs = [xflat, mask1, w1t, b1, w2t, b2]
    if has_proj:
        in_specs += [pl.BlockSpec((Cout_p, Cin_p), lambda n: (0, 0)),
                     pl.BlockSpec((Cout_p, 1), lambda n: (0, 0))]
        inputs += [wst, bs]

    out = pl.pallas_call(
        kernel,
        out_shape=jax.ShapeDtypeStruct((N_pad, Cout_p, Lpad), jnp.float32),
        grid=(G,),
        in_specs=in_specs,
        out_specs=pl.BlockSpec((B_blk, Cout_p, Lpad), lambda n: (n, 0, 0)),
        compiler_params=pltpu.CompilerParams(
            dimension_semantics=("parallel",)),
    )(*inputs)

    # drop pad channels / pad columns (cheap XLA slice outside the kernel; costs
    # one extra HBM pass -- keep the padded (Ho, Wf) layout if the consumer allows).
    return out[:N, :Cout, :L].reshape(N, Cout, Ho, Wf)[:, :, :, :Wo]


# ----------------------------- reference -------------------------------------
def _ref_forward(x, conv1_w, bn1, conv2_w, bn2, skip_w, skip_bn, stride, eps=1e-5):
    dn = ('NCHW', 'OIHW', 'NCHW')

    def bn(y, p):
        g, b, m, v = (t.reshape(1, -1, 1, 1) for t in p)
        return (y - m) / jnp.sqrt(v + eps) * g + b

    y = lax.conv_general_dilated(x, conv1_w, (stride, stride), ((1, 1), (1, 1)),
                                 dimension_numbers=dn)
    y = jnp.maximum(bn(y, bn1), 0.0)
    y = lax.conv_general_dilated(y, conv2_w, (1, 1), ((1, 1), (1, 1)),
                                 dimension_numbers=dn)
    y = bn(y, bn2)
    if skip_w is None:
        sk = x
    else:
        sk = lax.conv_general_dilated(x, skip_w, (stride, stride),
                                      ((0, 0), (0, 0)), dimension_numbers=dn)
        sk = bn(sk, skip_bn)
    return jnp.maximum(y + sk, 0.0)


def _bn_params(key, c):
    k1, k2, k3, k4 = jax.random.split(key, 4)
    gamma = 1.0 + 0.1 * jax.random.normal(k1, (c,), jnp.float32)
    beta = 0.1 * jax.random.normal(k2, (c,), jnp.float32)
    mean = 0.1 * jax.random.normal(k3, (c,), jnp.float32)
    var = jax.random.uniform(k4, (c,), jnp.float32, 0.5, 1.5)
    return gamma, beta, mean, var


def _run_case(key, N, Cin, Cout, H, W, stride):
    ks = jax.random.split(key, 7)
    x = jax.random.normal(ks[0], (N, Cin, H, W), jnp.float32)
    conv1_w = 0.1 * jax.random.normal(ks[1], (Cout, Cin, 3, 3), jnp.float32)
    conv2_w = 0.1 * jax.random.normal(ks[2], (Cout, Cout, 3, 3), jnp.float32)
    bn1 = _bn_params(ks[3], Cout)
    bn2 = _bn_params(ks[4], Cout)
    if stride != 1 or Cin != Cout:
        skip_w = 0.1 * jax.random.normal(ks[5], (Cout, Cin, 1, 1), jnp.float32)
        skip_bn = _bn_params(ks[6], Cout)
    else:
        skip_w, skip_bn = None, None

    out = jax.block_until_ready(
        residual_forward(x, conv1_w, bn1, conv2_w, bn2, skip_w, skip_bn,
                         stride=stride))
    ref = jax.block_until_ready(
        _ref_forward(x, conv1_w, bn1, conv2_w, bn2, skip_w, skip_bn, stride))
    # tolerance reflects bf16 MXU operands (f32 accumulation) vs the f32 reference
    np.testing.assert_allclose(np.asarray(out), np.asarray(ref),
                               rtol=3e-2, atol=3e-2)


if __name__ == "__main__":
    key = jax.random.PRNGKey(0)
    k1, k2, k3 = jax.random.split(key, 3)
    # residual(k=3, inp_dim=4, out_dim=8, stride=1): projection skip
    _run_case(k1, N=2, Cin=4, Cout=8, H=16, W=16, stride=1)
    # residual(k=3, inp_dim=8, out_dim=8, stride=1): identity skip
    _run_case(k2, N=2, Cin=8, Cout=8, H=16, W=16, stride=1)
    # residual(k=3, inp_dim=4, out_dim=8, stride=2): strided projection skip
    _run_case(k3, N=2, Cin=4, Cout=8, H=16, W=16, stride=2)
    print("KERNEL_OK")
</pallas_src>

<mosaic_0001>
module attributes {stable_mosaic.version = 11 : i64} {
  func.func @_residual_kernel(%arg0: i32, %arg1: memref<1x8x640xbf16, #tpu.memory_space<vmem>>, %arg2: memref<1x512xf32, #tpu.memory_space<vmem>>, %arg3: memref<9x8x8xbf16, #tpu.memory_space<vmem>>, %arg4: memref<8x1xf32, #tpu.memory_space<vmem>>, %arg5: memref<9x8x8xbf16, #tpu.memory_space<vmem>>, %arg6: memref<8x1xf32, #tpu.memory_space<vmem>>, %arg7: memref<8x8xbf16, #tpu.memory_space<vmem>>, %arg8: memref<8x1xf32, #tpu.memory_space<vmem>>, %arg9: memref<1x8x384xf32, #tpu.memory_space<vmem>>) attributes {dimension_semantics = [#tpu.dimension_semantics<parallel>], iteration_bounds = array<i64: 2>, scalar_prefetch = 0 : i64, scratch_operands = 0 : i64, tpu.core_type = #tpu.core_type<tc>, window_params = [{transform_indices = @transform_0, window_bounds = array<i64: 1, 8, 640>}, {pipeline_mode = #tpu.pipeline_mode<synchronous>, transform_indices = @transform_1, window_bounds = array<i64: 1, 512>}, {pipeline_mode = #tpu.pipeline_mode<synchronous>, transform_indices = @transform_2, window_bounds = array<i64: 9, 8, 8>}, {pipeline_mode = #tpu.pipeline_mode<synchronous>, transform_indices = @transform_3, window_bounds = array<i64: 8, 1>}, {pipeline_mode = #tpu.pipeline_mode<synchronous>, transform_indices = @transform_4, window_bounds = array<i64: 9, 8, 8>}, {pipeline_mode = #tpu.pipeline_mode<synchronous>, transform_indices = @transform_5, window_bounds = array<i64: 8, 1>}, {pipeline_mode = #tpu.pipeline_mode<synchronous>, transform_indices = @transform_6, window_bounds = array<i64: 8, 8>}, {pipeline_mode = #tpu.pipeline_mode<synchronous>, transform_indices = @transform_7, window_bounds = array<i64: 8, 1>}, {transform_indices = @transform_8, window_bounds = array<i64: 1, 8, 384>}]} {
    %c0 = arith.constant 0 : index
    %c0_0 = arith.constant 0 : index
    %0 = vector.load %arg7[%c0, %c0_0] : memref<8x8xbf16, #tpu.memory_space<vmem>>, vector<8x8xbf16>
    %c0_1 = arith.constant 0 : index
    %c0_2 = arith.constant 0 : index
    %1 = vector.load %arg8[%c0_1, %c0_2] : memref<8x1xf32, #tpu.memory_space<vmem>>, vector<8x1xf32>
    %c0_3 = arith.constant 0 : index
    %c0_4 = arith.constant 0 : index
    %2 = vector.load %arg2[%c0_3, %c0_4] : memref<1x512xf32, #tpu.memory_space<vmem>>, vector<1x512xf32>
    %c0_5 = arith.constant 0 : index
    %c0_6 = arith.constant 0 : index
    %3 = vector.load %arg4[%c0_5, %c0_6] : memref<8x1xf32, #tpu.memory_space<vmem>>, vector<8x1xf32>
    %c0_7 = arith.constant 0 : index
    %c0_8 = arith.constant 0 : index
    %4 = vector.load %arg6[%c0_7, %c0_8] : memref<8x1xf32, #tpu.memory_space<vmem>>, vector<8x1xf32>
    %c0_9 = arith.constant 0 : index
    %c0_10 = arith.constant 0 : index
    %c0_11 = arith.constant 0 : index
    %5 = vector.load %arg3[%c0_9, %c0_10, %c0_11] : memref<9x8x8xbf16, #tpu.memory_space<vmem>>, vector<1x8x8xbf16>
    %6 = vector.shape_cast %5 : vector<1x8x8xbf16> to vector<8x8xbf16>
    %c1 = arith.constant 1 : index
    %c0_12 = arith.constant 0 : index
    %c0_13 = arith.constant 0 : index
    %7 = vector.load %arg3[%c1, %c0_12, %c0_13] : memref<9x8x8xbf16, #tpu.memory_space<vmem>>, vector<1x8x8xbf16>
    %8 = vector.shape_cast %7 : vector<1x8x8xbf16> to vector<8x8xbf16>
    %c2 = arith.constant 2 : index
    %c0_14 = arith.constant 0 : index
    %c0_15 = arith.constant 0 : index
    %9 = vector.load %arg3[%c2, %c0_14, %c0_15] : memref<9x8x8xbf16, #tpu.memory_space<vmem>>, vector<1x8x8xbf16>
    %10 = vector.shape_cast %9 : vector<1x8x8xbf16> to vector<8x8xbf16>
    %c3 = arith.constant 3 : index
    %c0_16 = arith.constant 0 : index
    %c0_17 = arith.constant 0 : index
    %11 = vector.load %arg3[%c3, %c0_16, %c0_17] : memref<9x8x8xbf16, #tpu.memory_space<vmem>>, vector<1x8x8xbf16>
    %12 = vector.shape_cast %11 : vector<1x8x8xbf16> to vector<8x8xbf16>
    %c4 = arith.constant 4 : index
    %c0_18 = arith.constant 0 : index
    %c0_19 = arith.constant 0 : index
    %13 = vector.load %arg3[%c4, %c0_18, %c0_19] : memref<9x8x8xbf16, #tpu.memory_space<vmem>>, vector<1x8x8xbf16>
    %14 = vector.shape_cast %13 : vector<1x8x8xbf16> to vector<8x8xbf16>
    %c5 = arith.constant 5 : index
    %c0_20 = arith.constant 0 : index
    %c0_21 = arith.constant 0 : index
    %15 = vector.load %arg3[%c5, %c0_20, %c0_21] : memref<9x8x8xbf16, #tpu.memory_space<vmem>>, vector<1x8x8xbf16>
    %16 = vector.shape_cast %15 : vector<1x8x8xbf16> to vector<8x8xbf16>
    %c6 = arith.constant 6 : index
    %c0_22 = arith.constant 0 : index
    %c0_23 = arith.constant 0 : index
    %17 = vector.load %arg3[%c6, %c0_22, %c0_23] : memref<9x8x8xbf16, #tpu.memory_space<vmem>>, vector<1x8x8xbf16>
    %18 = vector.shape_cast %17 : vector<1x8x8xbf16> to vector<8x8xbf16>
    %c7 = arith.constant 7 : index
    %c0_24 = arith.constant 0 : index
    %c0_25 = arith.constant 0 : index
    %19 = vector.load %arg3[%c7, %c0_24, %c0_25] : memref<9x8x8xbf16, #tpu.memory_space<vmem>>, vector<1x8x8xbf16>
    %20 = vector.shape_cast %19 : vector<1x8x8xbf16> to vector<8x8xbf16>
    %c8 = arith.constant 8 : index
    %c0_26 = arith.constant 0 : index
    %c0_27 = arith.constant 0 : index
    %21 = vector.load %arg3[%c8, %c0_26, %c0_27] : memref<9x8x8xbf16, #tpu.memory_space<vmem>>, vector<1x8x8xbf16>
    %22 = vector.shape_cast %21 : vector<1x8x8xbf16> to vector<8x8xbf16>
    %c0_28 = arith.constant 0 : index
    %c0_29 = arith.constant 0 : index
    %c0_30 = arith.constant 0 : index
    %23 = vector.load %arg5[%c0_28, %c0_29, %c0_30] : memref<9x8x8xbf16, #tpu.memory_space<vmem>>, vector<1x8x8xbf16>
    %24 = vector.shape_cast %23 : vector<1x8x8xbf16> to vector<8x8xbf16>
    %c1_31 = arith.constant 1 : index
    %c0_32 = arith.constant 0 : index
    %c0_33 = arith.constant 0 : index
    %25 = vector.load %arg5[%c1_31, %c0_32, %c0_33] : memref<9x8x8xbf16, #tpu.memory_space<vmem>>, vector<1x8x8xbf16>
    %26 = vector.shape_cast %25 : vector<1x8x8xbf16> to vector<8x8xbf16>
    %c2_34 = arith.constant 2 : index
    %c0_35 = arith.constant 0 : index
    %c0_36 = arith.constant 0 : index
    %27 = vector.load %arg5[%c2_34, %c0_35, %c0_36] : memref<9x8x8xbf16, #tpu.memory_space<vmem>>, vector<1x8x8xbf16>
    %28 = vector.shape_cast %27 : vector<1x8x8xbf16> to vector<8x8xbf16>
    %c3_37 = arith.constant 3 : index
    %c0_38 = arith.constant 0 : index
    %c0_39 = arith.constant 0 : index
    %29 = vector.load %arg5[%c3_37, %c0_38, %c0_39] : memref<9x8x8xbf16, #tpu.memory_space<vmem>>, vector<1x8x8xbf16>
    %30 = vector.shape_cast %29 : vector<1x8x8xbf16> to vector<8x8xbf16>
    %c4_40 = arith.constant 4 : index
    %c0_41 = arith.constant 0 : index
    %c0_42 = arith.constant 0 : index
    %31 = vector.load %arg5[%c4_40, %c0_41, %c0_42] : memref<9x8x8xbf16, #tpu.memory_space<vmem>>, vector<1x8x8xbf16>
    %32 = vector.shape_cast %31 : vector<1x8x8xbf16> to vector<8x8xbf16>
    %c5_43 = arith.constant 5 : index
    %c0_44 = arith.constant 0 : index
    %c0_45 = arith.constant 0 : index
    %33 = vector.load %arg5[%c5_43, %c0_44, %c0_45] : memref<9x8x8xbf16, #tpu.memory_space<vmem>>, vector<1x8x8xbf16>
    %34 = vector.shape_cast %33 : vector<1x8x8xbf16> to vector<8x8xbf16>
    %c6_46 = arith.constant 6 : index
    %c0_47 = arith.constant 0 : index
    %c0_48 = arith.constant 0 : index
    %35 = vector.load %arg5[%c6_46, %c0_47, %c0_48] : memref<9x8x8xbf16, #tpu.memory_space<vmem>>, vector<1x8x8xbf16>
    %36 = vector.shape_cast %35 : vector<1x8x8xbf16> to vector<8x8xbf16>
    %c7_49 = arith.constant 7 : index
    %c0_50 = arith.constant 0 : index
    %c0_51 = arith.constant 0 : index
    %37 = vector.load %arg5[%c7_49, %c0_50, %c0_51] : memref<9x8x8xbf16, #tpu.memory_space<vmem>>, vector<1x8x8xbf16>
    %38 = vector.shape_cast %37 : vector<1x8x8xbf16> to vector<8x8xbf16>
    %c8_52 = arith.constant 8 : index
    %c0_53 = arith.constant 0 : index
    %c0_54 = arith.constant 0 : index
    %39 = vector.load %arg5[%c8_52, %c0_53, %c0_54] : memref<9x8x8xbf16, #tpu.memory_space<vmem>>, vector<1x8x8xbf16>
    %40 = vector.shape_cast %39 : vector<1x8x8xbf16> to vector<8x8xbf16>
    %c0_55 = arith.constant 0 : index
    %c0_56 = arith.constant 0 : index
    %c0_57 = arith.constant 0 : index
    %41 = vector.load %arg1[%c0_55, %c0_56, %c0_57] : memref<1x8x640xbf16, #tpu.memory_space<vmem>>, vector<1x8x640xbf16>
    %42 = vector.shape_cast %41 : vector<1x8x640xbf16> to vector<8x640xbf16>
    %43 = vector.extract_strided_slice %42 {offsets = [0, 0], sizes = [8, 512], strides = [1, 1]} : vector<8x640xbf16> to vector<8x512xbf16>
    %cst = arith.constant dense<0.000000e+00> : vector<8x512xf32>
    %44 = tpu.matmul %6, %43, %cst {dimension_numbers = #tpu.dot_dimension_numbers<[1], [0], [0], [1], [0, 0, 1, 1], [], []>} : vector<8x8xbf16>, vector<8x512xbf16>, vector<8x512xf32> -> vector<8x512xf32>
    %45 = vector.extract_strided_slice %42 {offsets = [0, 1], sizes = [8, 512], strides = [1, 1]} : vector<8x640xbf16> to vector<8x512xbf16>
    %cst_58 = arith.constant dense<0.000000e+00> : vector<8x512xf32>
    %46 = tpu.matmul %8, %45, %cst_58 {dimension_numbers = #tpu.dot_dimension_numbers<[1], [0], [0], [1], [0, 0, 1, 1], [], []>} : vector<8x8xbf16>, vector<8x512xbf16>, vector<8x512xf32> -> vector<8x512xf32>
    %47 = arith.addf %44, %46 : vector<8x512xf32>
    %48 = vector.extract_strided_slice %42 {offsets = [0, 2], sizes = [8, 512], strides = [1, 1]} : vector<8x640xbf16> to vector<8x512xbf16>
    %cst_59 = arith.constant dense<0.000000e+00> : vector<8x512xf32>
    %49 = tpu.matmul %10, %48, %cst_59 {dimension_numbers = #tpu.dot_dimension_numbers<[1], [0], [0], [1], [0, 0, 1, 1], [], []>} : vector<8x8xbf16>, vector<8x512xbf16>, vector<8x512xf32> -> vector<8x512xf32>
    %50 = arith.addf %47, %49 : vector<8x512xf32>
    %51 = vector.extract_strided_slice %42 {offsets = [0, 18], sizes = [8, 512], strides = [1, 1]} : vector<8x640xbf16> to vector<8x512xbf16>
    %cst_60 = arith.constant dense<0.000000e+00> : vector<8x512xf32>
    %52 = tpu.matmul %12, %51, %cst_60 {dimension_numbers = #tpu.dot_dimension_numbers<[1], [0], [0], [1], [0, 0, 1, 1], [], []>} : vector<8x8xbf16>, vector<8x512xbf16>, vector<8x512xf32> -> vector<8x512xf32>
    %53 = arith.addf %50, %52 : vector<8x512xf32>
    %54 = vector.extract_strided_slice %42 {offsets = [0, 19], sizes = [8, 512], strides = [1, 1]} : vector<8x640xbf16> to vector<8x512xbf16>
    %cst_61 = arith.constant dense<0.000000e+00> : vector<8x512xf32>
    %55 = tpu.matmul %14, %54, %cst_61 {dimension_numbers = #tpu.dot_dimension_numbers<[1], [0], [0], [1], [0, 0, 1, 1], [], []>} : vector<8x8xbf16>, vector<8x512xbf16>, vector<8x512xf32> -> vector<8x512xf32>
    %56 = arith.addf %53, %55 : vector<8x512xf32>
    %57 = vector.extract_strided_slice %42 {offsets = [0, 20], sizes = [8, 512], strides = [1, 1]} : vector<8x640xbf16> to vector<8x512xbf16>
    %cst_62 = arith.constant dense<0.000000e+00> : vector<8x512xf32>
    %58 = tpu.matmul %16, %57, %cst_62 {dimension_numbers = #tpu.dot_dimension_numbers<[1], [0], [0], [1], [0, 0, 1, 1], [], []>} : vector<8x8xbf16>, vector<8x512xbf16>, vector<8x512xf32> -> vector<8x512xf32>
    %59 = arith.addf %56, %58 : vector<8x512xf32>
    %60 = vector.extract_strided_slice %42 {offsets = [0, 36], sizes = [8, 512], strides = [1, 1]} : vector<8x640xbf16> to vector<8x512xbf16>
    %cst_63 = arith.constant dense<0.000000e+00> : vector<8x512xf32>
    %61 = tpu.matmul %18, %60, %cst_63 {dimension_numbers = #tpu.dot_dimension_numbers<[1], [0], [0], [1], [0, 0, 1, 1], [], []>} : vector<8x8xbf16>, vector<8x512xbf16>, vector<8x512xf32> -> vector<8x512xf32>
    %62 = arith.addf %59, %61 : vector<8x512xf32>
    %63 = vector.extract_strided_slice %42 {offsets = [0, 37], sizes = [8, 512], strides = [1, 1]} : vector<8x640xbf16> to vector<8x512xbf16>
    %cst_64 = arith.constant dense<0.000000e+00> : vector<8x512xf32>
    %64 = tpu.matmul %20, %63, %cst_64 {dimension_numbers = #tpu.dot_dimension_numbers<[1], [0], [0], [1], [0, 0, 1, 1], [], []>} : vector<8x8xbf16>, vector<8x512xbf16>, vector<8x512xf32> -> vector<8x512xf32>
    %65 = arith.addf %62, %64 : vector<8x512xf32>
    %66 = vector.extract_strided_slice %42 {offsets = [0, 38], sizes = [8, 512], strides = [1, 1]} : vector<8x640xbf16> to vector<8x512xbf16>
    %cst_65 = arith.constant dense<0.000000e+00> : vector<8x512xf32>
    %67 = tpu.matmul %22, %66, %cst_65 {dimension_numbers = #tpu.dot_dimension_numbers<[1], [0], [0], [1], [0, 0, 1, 1], [], []>} : vector<8x8xbf16>, vector<8x512xbf16>, vector<8x512xf32> -> vector<8x512xf32>
    %68 = arith.addf %65, %67 : vector<8x512xf32>
    %69 = vector.broadcast %3 : vector<8x1xf32> to vector<8x512xf32>
    %70 = arith.addf %68, %69 : vector<8x512xf32>
    %cst_66 = arith.constant 0.000000e+00 : f32
    %71 = vector.broadcast %cst_66 : f32 to vector<8x512xf32>
    %72 = arith.maximumf %70, %71 : vector<8x512xf32>
    %73 = vector.broadcast %2 : vector<1x512xf32> to vector<8x512xf32>
    %74 = arith.mulf %72, %73 : vector<8x512xf32>
    %75 = arith.truncf %74 : vector<8x512xf32> to vector<8x512xbf16>
    %76 = vector.extract_strided_slice %75 {offsets = [0, 0], sizes = [8, 384], strides = [1, 1]} : vector<8x512xbf16> to vector<8x384xbf16>
    %cst_67 = arith.constant dense<0.000000e+00> : vector<8x384xf32>
    %77 = tpu.matmul %24, %76, %cst_67 {dimension_numbers = #tpu.dot_dimension_numbers<[1], [0], [0], [1], [0, 0, 1, 1], [], []>} : vector<8x8xbf16>, vector<8x384xbf16>, vector<8x384xf32> -> vector<8x384xf32>
    %78 = vector.extract_strided_slice %75 {offsets = [0, 1], sizes = [8, 384], strides = [1, 1]} : vector<8x512xbf16> to vector<8x384xbf16>
    %cst_68 = arith.constant dense<0.000000e+00> : vector<8x384xf32>
    %79 = tpu.matmul %26, %78, %cst_68 {dimension_numbers = #tpu.dot_dimension_numbers<[1], [0], [0], [1], [0, 0, 1, 1], [], []>} : vector<8x8xbf16>, vector<8x384xbf16>, vector<8x384xf32> -> vector<8x384xf32>
    %80 = arith.addf %77, %79 : vector<8x384xf32>
    %81 = vector.extract_strided_slice %75 {offsets = [0, 2], sizes = [8, 384], strides = [1, 1]} : vector<8x512xbf16> to vector<8x384xbf16>
    %cst_69 = arith.constant dense<0.000000e+00> : vector<8x384xf32>
    %82 = tpu.matmul %28, %81, %cst_69 {dimension_numbers = #tpu.dot_dimension_numbers<[1], [0], [0], [1], [0, 0, 1, 1], [], []>} : vector<8x8xbf16>, vector<8x384xbf16>, vector<8x384xf32> -> vector<8x384xf32>
    %83 = arith.addf %80, %82 : vector<8x384xf32>
    %84 = vector.extract_strided_slice %75 {offsets = [0, 18], sizes = [8, 384], strides = [1, 1]} : vector<8x512xbf16> to vector<8x384xbf16>
    %cst_70 = arith.constant dense<0.000000e+00> : vector<8x384xf32>
    %85 = tpu.matmul %30, %84, %cst_70 {dimension_numbers = #tpu.dot_dimension_numbers<[1], [0], [0], [1], [0, 0, 1, 1], [], []>} : vector<8x8xbf16>, vector<8x384xbf16>, vector<8x384xf32> -> vector<8x384xf32>
    %86 = arith.addf %83, %85 : vector<8x384xf32>
    %87 = vector.extract_strided_slice %75 {offsets = [0, 19], sizes = [8, 384], strides = [1, 1]} : vector<8x512xbf16> to vector<8x384xbf16>
    %cst_71 = arith.constant dense<0.000000e+00> : vector<8x384xf32>
    %88 = tpu.matmul %32, %87, %cst_71 {dimension_numbers = #tpu.dot_dimension_numbers<[1], [0], [0], [1], [0, 0, 1, 1], [], []>} : vector<8x8xbf16>, vector<8x384xbf16>, vector<8x384xf32> -> vector<8x384xf32>
    %89 = arith.addf %86, %88 : vector<8x384xf32>
    %90 = vector.extract_strided_slice %75 {offsets = [0, 20], sizes = [8, 384], strides = [1, 1]} : vector<8x512xbf16> to vector<8x384xbf16>
    %cst_72 = arith.constant dense<0.000000e+00> : vector<8x384xf32>
    %91 = tpu.matmul %34, %90, %cst_72 {dimension_numbers = #tpu.dot_dimension_numbers<[1], [0], [0], [1], [0, 0, 1, 1], [], []>} : vector<8x8xbf16>, vector<8x384xbf16>, vector<8x384xf32> -> vector<8x384xf32>
    %92 = arith.addf %89, %91 : vector<8x384xf32>
    %93 = vector.extract_strided_slice %75 {offsets = [0, 36], sizes = [8, 384], strides = [1, 1]} : vector<8x512xbf16> to vector<8x384xbf16>
    %cst_73 = arith.constant dense<0.000000e+00> : vector<8x384xf32>
    %94 = tpu.matmul %36, %93, %cst_73 {dimension_numbers = #tpu.dot_dimension_numbers<[1], [0], [0], [1], [0, 0, 1, 1], [], []>} : vector<8x8xbf16>, vector<8x384xbf16>, vector<8x384xf32> -> vector<8x384xf32>
    %95 = arith.addf %92, %94 : vector<8x384xf32>
    %96 = vector.extract_strided_slice %75 {offsets = [0, 37], sizes = [8, 384], strides = [1, 1]} : vector<8x512xbf16> to vector<8x384xbf16>
    %cst_74 = arith.constant dense<0.000000e+00> : vector<8x384xf32>
    %97 = tpu.matmul %38, %96, %cst_74 {dimension_numbers = #tpu.dot_dimension_numbers<[1], [0], [0], [1], [0, 0, 1, 1], [], []>} : vector<8x8xbf16>, vector<8x384xbf16>, vector<8x384xf32> -> vector<8x384xf32>
    %98 = arith.addf %95, %97 : vector<8x384xf32>
    %99 = vector.extract_strided_slice %75 {offsets = [0, 38], sizes = [8, 384], strides = [1, 1]} : vector<8x512xbf16> to vector<8x384xbf16>
    %cst_75 = arith.constant dense<0.000000e+00> : vector<8x384xf32>
    %100 = tpu.matmul %40, %99, %cst_75 {dimension_numbers = #tpu.dot_dimension_numbers<[1], [0], [0], [1], [0, 0, 1, 1], [], []>} : vector<8x8xbf16>, vector<8x384xbf16>, vector<8x384xf32> -> vector<8x384xf32>
    %101 = arith.addf %98, %100 : vector<8x384xf32>
    %102 = vector.broadcast %4 : vector<8x1xf32> to vector<8x384xf32>
    %103 = arith.addf %101, %102 : vector<8x384xf32>
    %104 = vector.extract_strided_slice %42 {offsets = [0, 38], sizes = [8, 384], strides = [1, 1]} : vector<8x640xbf16> to vector<8x384xbf16>
    %cst_76 = arith.constant dense<0.000000e+00> : vector<8x384xf32>
    %105 = tpu.matmul %0, %104, %cst_76 {dimension_numbers = #tpu.dot_dimension_numbers<[1], [0], [0], [1], [0, 0, 1, 1], [], []>} : vector<8x8xbf16>, vector<8x384xbf16>, vector<8x384xf32> -> vector<8x384xf32>
    %106 = vector.broadcast %1 : vector<8x1xf32> to vector<8x384xf32>
    %107 = arith.addf %105, %106 : vector<8x384xf32>
    %108 = arith.addf %103, %107 : vector<8x384xf32>
    %cst_77 = arith.constant 0.000000e+00 : f32
    %109 = vector.broadcast %cst_77 : f32 to vector<8x384xf32>
    %110 = arith.maximumf %108, %109 : vector<8x384xf32>
    %c0_78 = arith.constant 0 : index
    %c0_79 = arith.constant 0 : index
    %c0_80 = arith.constant 0 : index
    %111 = vector.load %arg9[%c0_78, %c0_79, %c0_80] : memref<1x8x384xf32, #tpu.memory_space<vmem>>, vector<1x8x384xf32>
    %112 = vector.shape_cast %111 : vector<1x8x384xf32> to vector<8x384xf32>
    %113 = vector.shape_cast %110 : vector<8x384xf32> to vector<1x8x384xf32>
    tpu.vector_store %arg9[%c0_78, %c0_79, %c0_80], %113 {strides = array<i32>} : memref<1x8x384xf32, #tpu.memory_space<vmem>>, vector<1x8x384xf32>,
    return
  }
  func.func @transform_0(%arg0: i32) -> (i32, i32, i32) {
    %c0_i32 = arith.constant 0 : i32
    %c0_i32_0 = arith.constant 0 : i32
    %c0_i32_1 = arith.constant 0 : i32
    return %arg0, %c0_i32, %c0_i32_0 : i32, i32, i32
  }
  func.func @transform_1(%arg0: i32) -> (i32, i32) {
    %c0_i32 = arith.constant 0 : i32
    %c0_i32_0 = arith.constant 0 : i32
    %c0_i32_1 = arith.constant 0 : i32
    return %c0_i32, %c0_i32_0 : i32, i32
  }
  func.func @transform_2(%arg0: i32) -> (i32, i32, i32) {
    %c0_i32 = arith.constant 0 : i32
    %c0_i32_0 = arith.constant 0 : i32
    %c0_i32_1 = arith.constant 0 : i32
    %c0_i32_2 = arith.constant 0 : i32
    return %c0_i32, %c0_i32_0, %c0_i32_1 : i32, i32, i32
  }
  func.func @transform_3(%arg0: i32) -> (i32, i32) {
    %c0_i32 = arith.constant 0 : i32
    %c0_i32_0 = arith.constant 0 : i32
    %c0_i32_1 = arith.constant 0 : i32
    return %c0_i32, %c0_i32_0 : i32, i32
  }
  func.func @transform_4(%arg0: i32) -> (i32, i32, i32) {
    %c0_i32 = arith.constant 0 : i32
    %c0_i32_0 = arith.constant 0 : i32
    %c0_i32_1 = arith.constant 0 : i32
    %c0_i32_2 = arith.constant 0 : i32
    return %c0_i32, %c0_i32_0, %c0_i32_1 : i32, i32, i32
  }
  func.func @transform_5(%arg0: i32) -> (i32, i32) {
    %c0_i32 = arith.constant 0 : i32
    %c0_i32_0 = arith.constant 0 : i32
    %c0_i32_1 = arith.constant 0 : i32
    return %c0_i32, %c0_i32_0 : i32, i32
  }
  func.func @transform_6(%arg0: i32) -> (i32, i32) {
    %c0_i32 = arith.constant 0 : i32
    %c0_i32_0 = arith.constant 0 : i32
    %c0_i32_1 = arith.constant 0 : i32
    return %c0_i32, %c0_i32_0 : i32, i32
  }
  func.func @transform_7(%arg0: i32) -> (i32, i32) {
    %c0_i32 = arith.constant 0 : i32
    %c0_i32_0 = arith.constant 0 : i32
    %c0_i32_1 = arith.constant 0 : i32
    return %c0_i32, %c0_i32_0 : i32, i32
  }
  func.func @transform_8(%arg0: i32) -> (i32, i32, i32) {
    %c0_i32 = arith.constant 0 : i32
    %c0_i32_0 = arith.constant 0 : i32
    %c0_i32_1 = arith.constant 0 : i32
    return %arg0, %c0_i32, %c0_i32_0 : i32, i32, i32
  }
}

</mosaic_0001>

<bundles_post_ra>
// kernel: tpu_custom_call.1
= control target key start
LH: loop header
LB: loop body
LE: loop exit
PB: predicated region body
PF: predicated region fallthrough
CT: control target
= control target key end

     0   :  { %13 = vsyncpa [#allocation3], 0  ;;  %s3515_s0 = inlined_call_operand.vmem [shape: bf16[2,8,640], index: 0, kind: input, shape index: {}]   ;;  %s3516_s1 = inlined_call_operand.vmem [shape: f32[1,512], index: 1, kind: input, shape index: {}]   ;;  %s3517_s2 = inlined_call_operand.vmem [shape: bf16[9,8,8], index: 2, kind: input, shape index: {}]   ;;  %s3518_s3 = inlined_call_operand.vmem [shape: f32[8,1], index: 3, kind: input, shape index: {}]   ;;  %s3519_s4 = inlined_call_operand.vmem [shape: bf16[9,8,8], index: 4, kind: input, shape index: {}]   ;;  %s3520_s5 = inlined_call_operand.vmem [shape: f32[8,1], index: 5, kind: input, shape index: {}]   ;;  %s3521_s6 = inlined_call_operand.vmem [shape: bf16[8,8], index: 6, kind: input, shape index: {}]   ;;  %s3522_s7 = inlined_call_operand.vmem [shape: f32[8,1], index: 7, kind: input, shape index: {}]   ;;  %s3523_s8 = inlined_call_operand.hbm [shape: f32[2,8,384], index: 8, kind: output, shape index: {}]  }
   0x1   :  { %15 = vsyncpa [#allocation3 + $0x1], 0  ;;  %s2989_s27 = smov 0   ;;  %s2991_s28 = smov 0  }
   0x2   :  { %s2993_s29 = smov 0   ;;  %s2995_s30 = smov 0  }
   0x3 LB: > { %s3010_s9 = sadd.s32 4294967295, %s2930_s30   ;;  %s2555_s10 = sadd.s32 4294967294, %s2930_s30   ;;  %s2930_s30 = sphi %s2995_s30, %s3529_s30   ;;  %s2926_s29 = sphi %s2993_s29, %s3528_s29   ;;  %s2922_s28 = sphi %s2991_s28, %s3527_s28   ;;  %s2918_s27 = sphi %s2989_s27, %s3526_s27  }
   0x4   : > { %s3014_s11 = sadd.s32 1, %s2930_s30   ;;  %s201_s12 = sadd.s32 1, %s2926_s29 }
   0x5   : > { %s198_s13 = ssub.s32 %s2930_s30, %s3014_s11  ;;  %p211_p0 = scmp.ne.s32.totalorder %s2926_s29, %s2922_s28 }
   0x6   : > { %p199_p1 = scmp.eq.s32.totalorder %s198_s13, 0  ;;  %p212_p2 = scmp.eq.s32.totalorder %s3010_s9, 1 }
   0x7   : > { %p217_p3 = scmp.ne.s32.totalorder %s2922_s28, %s2918_s27  ;;  %p218_p4 = scmp.eq.s32.totalorder %s2555_s10, 1 }
   0x8   : > { %s3025_s14 = scalar_select %p199_p1, %s2926_s29, %s201_s12  }
   0x9   : > { %p3027_p5 = por %p212_p2, %p211_p0  ;;  %p3031_p6 = por %p218_p4, %p217_p3 }
   0xa   : > { %p2558_p7 = scmp.ge.s32.totalorder %s2930_s30, 1  ;;  %p265_p8 = scmp.lt.s32.totalorder %s2930_s30, 3 }
   0xc   : > { %p266_p9 = pnand %p2558_p7, %p265_p8 }
   0xd   : > { %p299_p10 = scmp.lt.s32.totalorder (!%p266_p9), %s3010_s9, 1  ;;  %v2932_v0 = vmov (!%p266_p9), 0   ;;  %s2933_s22 = smov (!%p266_p9), 127   ;;  %v308_v8 = vld [vmem:[%s3518_s3] sm:$0xff] (!%p266_p9)  ;;  %vm370_vm0 = vcmask (!%p266_p9), 1039360   ;;  %vm379_vm1 = vcmask (!%p266_p9), 1043456  }
   0xe   : > { %269 = sbr.rel (%p266_p9) target bundleno = 909 (0x38d), region = 52  ;;  %424 = vmatprep.mubr.bf16.mxu0 (!%p266_p9), %v2932_v0  ;;  %465 = vmatprep.mubr.bf16.mxu1 (!%p266_p9), %v2932_v0  ;;  %s2934_s23 = smov (!%p266_p9), 126   ;;  %v2560_v16 = vld [vmem:[%s3517_s2 + $0x4] sm:$0xf] (!%p266_p9)  ;;  %vm375_vm2 = vcmask (!%p266_p9), 64512   ;;  %vm581_vm3 = vcmask (!%p266_p9), 1031168  }
   0xf   : > { %2861 = vset.pattern.permute.xlu0 (!%p266_p9), %v2932_v0  ;;  %2862 = vset.pattern.permute.xlu1 (!%p266_p9), %v2932_v0  ;;  %s2935_s24 = smov (!%p266_p9), 110   ;;  %s2936_s25 = smov (!%p266_p9), 109   ;;  %v310_v28 = vld [vmem:[%s3517_s2] sm:$0xf] (!%p266_p9)  ;;  %vm697_vm4 = vcmask (!%p266_p9), 900096   ;;  %vm813_vm5 = vcmask (!%p266_p9), 891904  }
  0x10   : > { %s2937_s26 = smov (!%p266_p9), 108   ;;  %s2938_s10 = smov (!%p266_p9), 92   ;;  %v2561_v38 = vld [vmem:[%s3517_s2 + $0x8] sm:$0xf] (!%p266_p9)  ;;  %v2562_v48 = vld [vmem:[%s3517_s2 + $0xc] sm:$0xf] (!%p266_p9) }
  0x11   : > { %s2939_s12 = smov (!%p266_p9), 91   ;;  %s2940_s13 = smov (!%p266_p9), 90   ;;  %v2563_v59 = vld [vmem:[%s3517_s2 + $0x10] sm:$0xf] (!%p266_p9)  ;;  %vm929_vm6 = vcmask (!%p266_p9), 883712   ;;  %vm1045_vm7 = vcmask (!%p266_p9), 752640  }
  0x12   : > { %vm1161_vm8 = vcmask (!%p266_p9), 744448   ;;  %vm1277_vm9 = vcmask (!%p266_p9), 736256   ;;  %vm2942_vm10 = vmmov (!%p266_p9), 0  }
  0x15   : > { %s300_s17 = scalar_select %p299_p10, %s3010_s9, 1 }
  0x17   : > { %s2809_s18 = smul.u32 20, %s300_s17  ;;  %s296_s17 = sand.u32 1, %s2922_s28  }
  0x19   : > { %s303_s21 = scalar_lea.vmem %s3515_s0, %s2809_s18  ;;  %s2808_s18 = smul.u32 24, %s296_s17 }
  0x1a   : > { %v345_v1 = vld [vmem:[%s303_s21 + $0x8] sm:$0xff]  ;;  %v344_v2 = vld [vmem:[%s303_s21] sm:$0xff]  ;;  %v2867_v7 = vld [vmem:[%s303_s21 + $0x10] ss:$0 sps:$4 sm:$0xff]  }
  0x1b   : > { %v3046_v3 = vcombine.low %v345_v1, %v345_v1  ;;  %v3048_v4 = vcombine.low %v344_v2, %v344_v2  ;;  %v3054_v5 = vcombine.high %v345_v1, %v345_v1  ;;  %v3056_v6 = vcombine.high %v344_v2, %v344_v2 }
  0x1d   : > { %364 = vrot.lane.b32.xlu1 %v3046_v3, %s2933_s22  ;;  %360 = vrot.lane.b32.xlu0 %v3048_v4, %s2933_s22  ;;  %v478_v20 = vsel %vm379_vm1, %v3048_v4, 0  ;;  %v484_v25 = vsel %vm379_vm1, %v3046_v3, 0 }
  0x21   : > { %366 = vrot.lane.b32.xlu1 %v3054_v5, %s2933_s22  ;;  %362 = vrot.lane.b32.xlu0 %v3056_v6, %s2933_s22 }
  0x25   : > { %571 = vrot.lane.b32.xlu1 %v3048_v4, %s2934_s23  ;;  %368 = vrot.lane.b32.xlu0 %v2867_v7, %s2933_s22 }
  0x29   : > { %575 = vrot.lane.b32.xlu1 %v3046_v3, %s2934_s23  ;;  %573 = vrot.lane.b32.xlu0 %v3056_v6, %s2934_s23 }
  0x2d   : > { %579 = vrot.lane.b32.xlu1 %v2867_v7, %s2934_s23  ;;  %577 = vrot.lane.b32.xlu0 %v3054_v5, %s2934_s23 }
  0x31   : > { %689 = vrot.lane.b32.xlu1 %v3056_v6, %s2935_s24  ;;  %687 = vrot.lane.b32.xlu0 %v3048_v4, %s2935_s24 }
  0x35   : > { %693 = vrot.lane.b32.xlu1 %v3054_v5, %s2935_s24  ;;  %691 = vrot.lane.b32.xlu0 %v3046_v3, %s2935_s24 }
  0x39   : > { %803 = vrot.lane.b32.xlu1 %v3048_v4, %s2936_s25  ;;  %695 = vrot.lane.b32.xlu0 %v2867_v7, %s2935_s24 }
  0x3d   : > { %807 = vrot.lane.b32.xlu1 %v3046_v3, %s2936_s25  ;;  %805 = vrot.lane.b32.xlu0 %v3056_v6, %s2936_s25 }
  0x41   : > { %811 = vrot.lane.b32.xlu1 %v2867_v7, %s2936_s25  ;;  %809 = vrot.lane.b32.xlu0 %v3054_v5, %s2936_s25 }
  0x45   : > { %921 = vrot.lane.b32.xlu1 %v3056_v6, %s2937_s26  ;;  %919 = vrot.lane.b32.xlu0 %v3048_v4, %s2937_s26 }
  0x49   : > { %925 = vrot.lane.b32.xlu1 %v3054_v5, %s2937_s26  ;;  %923 = vrot.lane.b32.xlu0 %v3046_v3, %s2937_s26 }
  0x4d   : > { %1035 = vrot.lane.b32.xlu1 %v3048_v4, %s2938_s10  ;;  %927 = vrot.lane.b32.xlu0 %v2867_v7, %s2937_s26 }
  0x51   : > { %1039 = vrot.lane.b32.xlu1 %v3046_v3, %s2938_s10  ;;  %1037 = vrot.lane.b32.xlu0 %v3056_v6, %s2938_s10 }
  0x55   : > { %1043 = vrot.lane.b32.xlu1 %v2867_v7, %s2938_s10  ;;  %1041 = vrot.lane.b32.xlu0 %v3054_v5, %s2938_s10 }
  0x59   : > { %1153 = vrot.lane.b32.xlu1 %v3056_v6, %s2939_s12  ;;  %1151 = vrot.lane.b32.xlu0 %v3048_v4, %s2939_s12 }
  0x5d   : > { %1157 = vrot.lane.b32.xlu1 %v3054_v5, %s2939_s12  ;;  %1155 = vrot.lane.b32.xlu0 %v3046_v3, %s2939_s12 }
  0x61   : > { %1267 = vrot.lane.b32.xlu1 %v3048_v4, %s2940_s13  ;;  %1159 = vrot.lane.b32.xlu0 %v2867_v7, %s2939_s12 }
  0x65   : > { %1271 = vrot.lane.b32.xlu1 %v3046_v3, %s2940_s13  ;;  %1269 = vrot.lane.b32.xlu0 %v3056_v6, %s2940_s13 }
  0x69   : > { %1275 = vrot.lane.b32.xlu1 %v2867_v7, %s2940_s13  ;;  %1273 = vrot.lane.b32.xlu0 %v3054_v5, %s2940_s13 }
  0x6d   : > { %1385 = vperm.xlu0 %2861, %v308_v8  }
  0x8f   : > { %v365_v9 = vpop.permute.xlu1 %364  ;;  %v361_v10 = vpop.permute.xlu0 %360 }
  0x93   : > { %v367_v11 = vpop.permute.xlu1 %366  ;;  %v363_v12 = vpop.permute.xlu0 %362 }
  0x94   : > { %v372_v13 = vsel %vm370_vm0, %v363_v12, %v365_v9  ;;  %v371_v14 = vsel %vm370_vm0, %v361_v10, %v363_v12  ;;  %v373_v17 = vsel %vm370_vm0, %v365_v9, %v367_v11 }
  0x95   : > { %2581 = vmatprep.subr.msk.bf16.mxu0 %vm379_vm1, %v372_v13  ;;  %v381_v15 = vsel %vm379_vm1, %v371_v14, 0  ;;  %v387_v22 = vsel %vm379_vm1, %v373_v17, 0 }
  0x96   : > { %393 = vmatpush1.bf16.msra.mxu0 %v381_v15  ;;  %v2565_v15 = vld [vmem:[%s3517_s2 + $0x18] sm:$0xf] }
  0x97   : > { %v572_v18 = vpop.permute.xlu1 %571  ;;  %v369_v19 = vpop.permute.xlu0 %368  ;;  %2585 = vmatprep.subr.msk.bf16.mxu0 %vm379_vm1, %v3056_v6 }
  0x98   : > { %v374_v21 = vsel %vm370_vm0, %v367_v11, %v369_v19 }
  0x99   : > { %2582 = vmatmul.mubr.msk.bf16.vlgmr.msra.gmra.mrb[0].mxu0 %vm375_vm2, %v2560_v16  ;;  %2583 = vmatprep.subr.msk.bf16.mxu1 %vm379_vm1, %v374_v21 }
  0x9a   : > { %434 = vmatpush1.bf16.msra.mxu1 %v387_v22  ;;  %490 = vmatpush1.bf16.msra.mxu0 %v478_v20 }
  0x9b   : > { %v576_v23 = vpop.permute.xlu1 %575  ;;  %v574_v24 = vpop.permute.xlu0 %573  ;;  %2587 = vmatprep.subr.msk.bf16.mxu1 %vm379_vm1, %v3054_v5  ;;  %521 = vmatprep.mubr.bf16.mxu0 %v2932_v0  ;;  %v2564_v5 = vld [vmem:[%s3517_s2 + $0x14] sm:$0xf] }
  0x9c   : > { %v583_v26 = vsel %vm581_vm3, %v574_v24, %v576_v23  ;;  %v582_v27 = vsel %vm581_vm3, %v572_v18, %v574_v24 }
  0x9d   : > { %2584 = vmatmul.mubr.msk.bf16.vlgmr.msra.gmra.mrb[0].mxu1 %vm375_vm2, %v2560_v16  ;;  %2589 = vmatprep.subr.msk.bf16.mxu0 %vm379_vm1, %v583_v26  ;;  %v590_v32 = vsel %vm379_vm1, %v582_v27, 0 }
  0x9e   : > { %531 = vmatpush1.bf16.msra.mxu1 %v484_v25  ;;  %562 = vmatprep.mubr.bf16.mxu1 %v2932_v0 }
  0x9f   : > { %v580_v29 = vpop.permute.xlu1 %579  ;;  %v578_v30 = vpop.permute.xlu0 %577 }
  0xa0   : > { %v585_v31 = vsel %vm581_vm3, %v578_v30, %v580_v29  ;;  %v584_v33 = vsel %vm581_vm3, %v576_v23, %v578_v30  ;;  %v2566_v29 = vld [vmem:[%s3517_s2 + $0x1c] sm:$0xf] }
  0xa1   : > { %2586 = vmatmul.mubr.msk.bf16.vlgmr.msra.gmra.mrb[4].mxu0 %vm375_vm2, %v310_v28  ;;  %2591 = vmatprep.subr.msk.bf16.mxu1 %vm379_vm1, %v585_v31  ;;  %v596_v36 = vsel %vm379_vm1, %v584_v33, 0 }
  0xa2   : > { %602 = vmatpush1.bf16.msra.mxu0 %v590_v32  ;;  %633 = vmatprep.mubr.bf16.mxu0 %v2932_v0 }
  0xa3   : > { %v690_v34 = vpop.permute.xlu1 %689  ;;  %v688_v35 = vpop.permute.xlu0 %687 }
  0xa4   : > { %v698_v37 = vsel %vm697_vm4, %v688_v35, %v690_v34 }
  0xa5   : > { %2588 = vmatmul.mubr.msk.bf16.vlgmr.msra.gmra.mrb[4].mxu1 %vm375_vm2, %v310_v28  ;;  %v706_v42 = vsel %vm379_vm1, %v698_v37, 0 }
  0xa6   : > { %643 = vmatpush1.bf16.msra.mxu1 %v596_v36  ;;  %674 = vmatprep.mubr.bf16.mxu1 %v2932_v0 }
  0xa7   : > { %v694_v39 = vpop.permute.xlu1 %693  ;;  %v692_v40 = vpop.permute.xlu0 %691 }
  0xa8   : > { %v699_v41 = vsel %vm697_vm4, %v690_v34, %v692_v40  ;;  %v700_v43 = vsel %vm697_vm4, %v692_v40, %v694_v39 }
  0xa9   : > { %2590 = vmatmul.mubr.msk.bf16.vlgmr.msra.gmra.mrb[8].mxu0 %vm375_vm2, %v2561_v38  ;;  %2593 = vmatprep.subr.msk.bf16.mxu0 %vm379_vm1, %v699_v41  ;;  %v712_v47 = vsel %vm379_vm1, %v700_v43, 0 }
  0xaa   : > { %718 = vmatpush1.bf16.msra.mxu0 %v706_v42  ;;  %749 = vmatprep.mubr.bf16.mxu0 %v2932_v0 }
  0xab   : > { %v804_v44 = vpop.permute.xlu1 %803  ;;  %v696_v45 = vpop.permute.xlu0 %695 }
  0xac   : > { %v701_v46 = vsel %vm697_vm4, %v694_v39, %v696_v45  ;;  %v2567_v39 = vld [vmem:[%s3517_s2 + $0x20] sm:$0xf] }
  0xad   : > { %2592 = vmatmul.mubr.msk.bf16.vlgmr.msra.gmra.mrb[8].mxu1 %vm375_vm2, %v2561_v38  ;;  %2595 = vmatprep.subr.msk.bf16.mxu1 %vm379_vm1, %v701_v46 }
  0xae   : > { %759 = vmatpush1.bf16.msra.mxu1 %v712_v47  ;;  %790 = vmatprep.mubr.bf16.mxu1 %v2932_v0 }
  0xaf   : > { %v808_v49 = vpop.permute.xlu1 %807  ;;  %v806_v50 = vpop.permute.xlu0 %805 }
  0xb0   : > { %v814_v51 = vsel %vm813_vm5, %v804_v44, %v806_v50  ;;  %v815_v52 = vsel %vm813_vm5, %v806_v50, %v808_v49 }
  0xb1   : > { %v822_v53 = vsel %vm379_vm1, %v814_v51, 0  ;;  %2594 = vmatmul.mubr.msk.bf16.vlgmr.msra.gmra.mrb[12].mxu0 %vm375_vm2, %v2562_v48  ;;  %2597 = vmatprep.subr.msk.bf16.mxu0 %vm379_vm1, %v815_v52 }
  0xb2   : > { %834 = vmatpush1.bf16.msra.mxu0 %v822_v53  ;;  %865 = vmatprep.mubr.bf16.mxu0 %v2932_v0 }
  0xb3   : > { %v812_v54 = vpop.permute.xlu1 %811  ;;  %v810_v55 = vpop.permute.xlu0 %809 }
  0xb4   : > { %v816_v56 = vsel %vm813_vm5, %v808_v49, %v810_v55  ;;  %v817_v57 = vsel %vm813_vm5, %v810_v55, %v812_v54 }
  0xb5   : > { %v828_v58 = vsel %vm379_vm1, %v816_v56, 0  ;;  %2596 = vmatmul.mubr.msk.bf16.vlgmr.msra.gmra.mrb[12].mxu1 %vm375_vm2, %v2562_v48  ;;  %2599 = vmatprep.subr.msk.bf16.mxu1 %vm379_vm1, %v817_v57 }
  0xb6   : > { %875 = vmatpush1.bf16.msra.mxu1 %v828_v58  ;;  %906 = vmatprep.mubr.bf16.mxu1 %v2932_v0 }
  0xb7   : > { %v922_v60 = vpop.permute.xlu1 %921  ;;  %v920_v61 = vpop.permute.xlu0 %919 }
  0xb8   : > { %v930_v62 = vsel %vm929_vm6, %v920_v61, %v922_v60 }
  0xb9   : > { %2598 = vmatmul.mubr.msk.bf16.vlgmr.msra.gmra.mrb[16].mxu0 %vm375_vm2, %v2563_v59  ;;  %v938_v3 = vsel %vm379_vm1, %v930_v62, 0 }
  0xba   : > { %981 = vmatprep.mubr.bf16.mxu0 %v2932_v0 }
  0xbb   : > { %v926_v63 = vpop.permute.xlu1 %925  ;;  %v924_v1 = vpop.permute.xlu0 %923 }
  0xbc   : > { %v931_v2 = vsel %vm929_vm6, %v922_v60, %v924_v1  ;;  %v932_v4 = vsel %vm929_vm6, %v924_v1, %v926_v63 }
  0xbd   : > { %2600 = vmatmul.mubr.msk.bf16.vlgmr.msra.gmra.mrb[16].mxu1 %vm375_vm2, %v2563_v59  ;;  %2601 = vmatprep.subr.msk.bf16.mxu0 %vm379_vm1, %v931_v2  ;;  %v944_v9 = vsel %vm379_vm1, %v932_v4, 0 }
  0xbe   : > { %950 = vmatpush1.bf16.msra.mxu0 %v938_v3  ;;  %1022 = vmatprep.mubr.bf16.mxu1 %v2932_v0 }
  0xbf   : > { %v1036_v6 = vpop.permute.xlu1 %1035  ;;  %v928_v7 = vpop.permute.xlu0 %927 }
  0xc0   : > { %v933_v8 = vsel %vm929_vm6, %v926_v63, %v928_v7 }
  0xc1   : > { %2602 = vmatmul.mubr.msk.bf16.vlgmr.msra.gmra.mrb[20].mxu0 %vm375_vm2, %v2564_v5  ;;  %2603 = vmatprep.subr.msk.bf16.mxu1 %vm379_vm1, %v933_v8 }
  0xc2   : > { %991 = vmatpush1.bf16.msra.mxu1 %v944_v9  ;;  %1097 = vmatprep.mubr.bf16.mxu0 %v2932_v0 }
  0xc3   : > { %v1040_v10 = vpop.permute.xlu1 %1039  ;;  %v1038_v11 = vpop.permute.xlu0 %1037 }
  0xc4   : > { %v1046_v12 = vsel %vm1045_vm7, %v1036_v6, %v1038_v11  ;;  %v1047_v13 = vsel %vm1045_vm7, %v1038_v11, %v1040_v10 }
  0xc5   : > { %v1054_v14 = vsel %vm379_vm1, %v1046_v12, 0  ;;  %2604 = vmatmul.mubr.msk.bf16.vlgmr.msra.gmra.mrb[20].mxu1 %vm375_vm2, %v2564_v5  ;;  %2605 = vmatprep.subr.msk.bf16.mxu0 %vm379_vm1, %v1047_v13 }
  0xc6   : > { %1066 = vmatpush1.bf16.msra.mxu0 %v1054_v14  ;;  %1138 = vmatprep.mubr.bf16.mxu1 %v2932_v0 }
  0xc7   : > { %v1044_v16 = vpop.permute.xlu1 %1043  ;;  %v1042_v17 = vpop.permute.xlu0 %1041 }
  0xc8   : > { %v1048_v18 = vsel %vm1045_vm7, %v1040_v10, %v1042_v17  ;;  %v1049_v19 = vsel %vm1045_vm7, %v1042_v17, %v1044_v16 }
  0xc9   : > { %v1060_v20 = vsel %vm379_vm1, %v1048_v18, 0  ;;  %2606 = vmatmul.mubr.msk.bf16.vlgmr.msra.gmra.mrb[24].mxu0 %vm375_vm2, %v2565_v15  ;;  %2607 = vmatprep.subr.msk.bf16.mxu1 %vm379_vm1, %v1049_v19 }
  0xca   : > { %1107 = vmatpush1.bf16.msra.mxu1 %v1060_v20  ;;  %1213 = vmatprep.mubr.bf16.mxu0 %v2932_v0 }
  0xcb   : > { %v1154_v21 = vpop.permute.xlu1 %1153  ;;  %v1152_v22 = vpop.permute.xlu0 %1151 }
  0xcc   : > { %v1162_v23 = vsel %vm1161_vm8, %v1152_v22, %v1154_v21 }
  0xcd   : > { %2608 = vmatmul.mubr.msk.bf16.vlgmr.msra.gmra.mrb[24].mxu1 %vm375_vm2, %v2565_v15  ;;  %v1170_v27 = vsel %vm379_vm1, %v1162_v23, 0 }
  0xce   : > { %1254 = vmatprep.mubr.bf16.mxu1 %v2932_v0 }
  0xcf   : > { %v1158_v24 = vpop.permute.xlu1 %1157  ;;  %v1156_v25 = vpop.permute.xlu0 %1155 }
  0xd0   : > { %v1163_v26 = vsel %vm1161_vm8, %v1154_v21, %v1156_v25  ;;  %v1164_v28 = vsel %vm1161_vm8, %v1156_v25, %v1158_v24 }
  0xd1   : > { %2609 = vmatprep.subr.msk.bf16.mxu0 %vm379_vm1, %v1163_v26  ;;  %v1176_v33 = vsel %vm379_vm1, %v1164_v28, 0 }
  0xd2   : > { %1182 = vmatpush1.bf16.msra.mxu0 %v1170_v27 }
  0xd3   : > { %v1268_v30 = vpop.permute.xlu1 %1267  ;;  %v1160_v31 = vpop.permute.xlu0 %1159 }
  0xd4   : > { %v1165_v32 = vsel %vm1161_vm8, %v1158_v24, %v1160_v31 }
  0xd5   : > { %2610 = vmatmul.mubr.msk.bf16.vlgmr.msra.gmra.mrb[28].mxu0 %vm375_vm2, %v2566_v29  ;;  %2611 = vmatprep.subr.msk.bf16.mxu1 %vm379_vm1, %v1165_v32 }
  0xd6   : > { %1223 = vmatpush1.bf16.msra.mxu1 %v1176_v33  ;;  %1329 = vmatprep.mubr.bf16.mxu0 %v2932_v0 }
  0xd7   : > { %v1272_v34 = vpop.permute.xlu1 %1271  ;;  %v1270_v35 = vpop.permute.xlu0 %1269 }
  0xd8   : > { %v1278_v36 = vsel %vm1277_vm9, %v1268_v30, %v1270_v35  ;;  %v3249_v37 = vsel %vm1277_vm9, %v1270_v35, %v1272_v34 }
  0xd9   : > { %v3252_v38 = vsel %vm379_vm1, %v1278_v36, 0  ;;  %2612 = vmatmul.mubr.msk.bf16.vlgmr.msra.gmra.mrb[28].mxu1 %vm375_vm2, %v2566_v29  ;;  %2613 = vmatprep.subr.msk.bf16.mxu0 %vm379_vm1, %v3249_v37 }
  0xda   : > { %1298 = vmatpush1.bf16.msra.mxu0 %v3252_v38  ;;  %1370 = vmatprep.mubr.bf16.mxu1 %v2932_v0 }
  0xdb   : > { %v1276_v40 = vpop.permute.xlu1 %1275  ;;  %v1274_v41 = vpop.permute.xlu0 %1273 }
  0xdc   : > { %v1280_v42 = vsel %vm1277_vm9, %v1272_v34, %v1274_v41  ;;  %v1281_v43 = vsel %vm1277_vm9, %v1274_v41, %v1276_v40 }
  0xdd   : > { %v3265_v44 = vsel %vm379_vm1, %v1280_v42, 0  ;;  %2614 = vmatmul.mubr.msk.bf16.vlgmr.msra.gmra.mrb[32].mxu0 %vm375_vm2, %v2567_v39  ;;  %2615 = vmatprep.subr.msk.bf16.mxu1 %vm379_vm1, %v1281_v43 }
  0xde   : > { %1339 = vmatpush1.bf16.msra.mxu1 %v3265_v44  ;;  %1484 = vmatprep.mubr.bf16.mxu0 %v2932_v0 }
  0xe1   : > { %2616 = vmatmul.mubr.msk.bf16.vlgmr.msra.gmra.mrb[32].mxu1 %vm375_vm2, %v2567_v39 }
 0x16c   : > { %v426_v45 = vpop.f32.mrb[0].mxu0 }
 0x16d   : > { %v428_v46 = vpop.f32.mrb[1].mxu0 }
 0x16e   : > { %v430_v47 = vpop.f32.mrb[2].mxu0 }
 0x16f   : > { %v431_v48 = vpop.f32.mrb[3].mxu0 }
 0x170   : > { %v467_v49 = vpop.f32.mrb[0].mxu1 }
 0x171   : > { %v469_v50 = vpop.f32.mrb[1].mxu1 }
 0x172   : > { %v471_v51 = vpop.f32.mrb[2].mxu1 }
 0x173   : > { %v472_v52 = vpop.f32.mrb[3].mxu1 }
 0x174   : > { %v523_v53 = vpop.f32.mrb[4].mxu0 }
 0x175   : > { %v524_v54 = vadd.f32 %v523_v53, %v426_v45  ;;  %v525_v55 = vpop.f32.mrb[5].mxu0 }
 0x176   : > { %v526_v56 = vadd.f32 %v525_v55, %v428_v46  ;;  %v527_v57 = vpop.f32.mrb[6].mxu0 }
 0x177   : > { %v528_v58 = vpop.f32.mrb[7].mxu0 }
 0x178   : > { %v564_v59 = vpop.f32.mrb[4].mxu1 }
 0x179   : > { %v565_v60 = vadd.f32 %v564_v59, %v467_v49  ;;  %v566_v61 = vpop.f32.mrb[5].mxu1 }
 0x17a   : > { %v567_v62 = vadd.f32 %v566_v61, %v469_v50  ;;  %v568_v63 = vpop.f32.mrb[6].mxu1 }
 0x17b   : > { %v569_v1 = vpop.f32.mrb[7].mxu1 }
 0x17c   : > { %v635_v2 = vpop.f32.mrb[8].mxu0 }
 0x17d   : > { %v683_v3 = vadd.f32 %v635_v2, %v524_v54  ;;  %v637_v4 = vpop.f32.mrb[9].mxu0  ;;  %v1397_v2 = vlaneseq }
 0x17e   : > { %v684_v5 = vadd.f32 %v637_v4, %v526_v56  ;;  %v639_v6 = vpop.f32.mrb[10].mxu0 }
 0x17f   : > { %v640_v7 = vpop.f32.mrb[11].mxu0 }
 0x180   : > { %v676_v8 = vpop.f32.mrb[8].mxu1 }
 0x181   : > { %v685_v9 = vadd.f32 %v676_v8, %v565_v60  ;;  %v678_v10 = vpop.f32.mrb[9].mxu1 }
 0x182   : > { %v686_v11 = vadd.f32 %v678_v10, %v567_v62  ;;  %v680_v12 = vpop.f32.mrb[10].mxu1 }
 0x183   : > { %v681_v13 = vpop.f32.mrb[11].mxu1 }
 0x184   : > { %v751_v14 = vpop.f32.mrb[12].mxu0 }
 0x185   : > { %v799_v15 = vadd.f32 %v751_v14, %v683_v3  ;;  %v753_v16 = vpop.f32.mrb[13].mxu0 }
 0x186   : > { %v800_v17 = vadd.f32 %v753_v16, %v684_v5  ;;  %v755_v18 = vpop.f32.mrb[14].mxu0 }
 0x187   : > { %v756_v19 = vpop.f32.mrb[15].mxu0  ;;  %v307_v18 = vld [vmem:[%s3516_s1] sm:$0xf] }
 0x188   : > { %v792_v20 = vpop.f32.mrb[12].mxu1  ;;  %v1386_v19 = vpop.permute.xlu0 %1385 }
 0x189   : > { %v801_v21 = vadd.f32 %v792_v20, %v685_v9  ;;  %v794_v22 = vpop.f32.mrb[13].mxu1  ;;  %v1398_v9 = vshrl.u32 %v1397_v2, 7 }
 0x18a   : > { %v802_v23 = vadd.f32 %v794_v22, %v686_v11  ;;  %v796_v24 = vpop.f32.mrb[14].mxu1 }
 0x18b   : > { %v797_v25 = vpop.f32.mrb[15].mxu1  ;;  %v1399_v16 = vsub.s32 0, %v1398_v9  ;;  %v1403_v22 = vsub.s32 1, %v1398_v9 }
 0x18c   : > { %v867_v26 = vpop.f32.mrb[16].mxu0 }
 0x18d   : > { %v915_v27 = vadd.f32 %v867_v26, %v799_v15  ;;  %v869_v28 = vpop.f32.mrb[17].mxu0  ;;  %v1400_v25 = vrot.slane %v307_v18, %v1399_v16  ;;  %v327_v16 = vld [vmem:[%s3519_s4] sm:$0xf] }
 0x18e   : > { %v916_v29 = vadd.f32 %v869_v28, %v800_v17  ;;  %v871_v30 = vpop.f32.mrb[18].mxu0  ;;  %v1407_v28 = vsub.s32 2, %v1398_v9 }
 0x18f   : > { %v872_v31 = vpop.f32.mrb[19].mxu0 }
 0x190   : > { %v908_v32 = vpop.f32.mrb[16].mxu1  ;;  %v1404_v31 = vrot.slane %v307_v18, %v1403_v22 }
 0x191   : > { %v917_v33 = vadd.f32 %v908_v32, %v801_v21  ;;  %v910_v34 = vpop.f32.mrb[17].mxu1 }
 0x192   : > { %v918_v35 = vadd.f32 %v910_v34, %v802_v23  ;;  %v912_v36 = vpop.f32.mrb[18].mxu1 }
 0x193   : > { %v913_v39 = vpop.f32.mrb[19].mxu1 }
 0x194   : > { %v983_v40 = vpop.f32.mrb[20].mxu0 }
 0x195   : > { %v1031_v41 = vadd.f32 %v983_v40, %v915_v27  ;;  %v985_v42 = vpop.f32.mrb[21].mxu0 }
 0x196   : > { %v1032_v43 = vadd.f32 %v985_v42, %v916_v29  ;;  %v987_v45 = vpop.f32.mrb[22].mxu0 }
 0x197   : > { %v988_v46 = vpop.f32.mrb[23].mxu0 }
 0x198   : > { %v1024_v47 = vpop.f32.mrb[20].mxu1 }
 0x199   : > { %v1033_v48 = vadd.f32 %v1024_v47, %v917_v33  ;;  %v1026_v49 = vpop.f32.mrb[21].mxu1  ;;  %v2941_v47 = vmov 0.0  }
 0x19a   : > { %v1034_v50 = vadd.f32 %v1026_v49, %v918_v35  ;;  %v1028_v51 = vpop.f32.mrb[22].mxu1  ;;  %v1411_v35 = vsub.s32 3, %v1398_v9  ;;  %2670 = vmatprep.subr.bf16.mxu1 %v2941_v47  ;;  %2672 = vmatprep.mubr.msk.bf16.mxu1 %vm2942_vm10, %v2941_v47 }
 0x19b   : > { %v1029_v52 = vpop.f32.mrb[23].mxu1 }
 0x19c   : > { %v1099_v53 = vpop.f32.mrb[24].mxu0  ;;  %v1412_v51 = vrot.slane %v307_v18, %v1411_v35 }
 0x19d   : > { %v1147_v54 = vadd.f32 %v1099_v53, %v1031_v41  ;;  %v1101_v55 = vpop.f32.mrb[25].mxu0 }
 0x19e   : > { %v1148_v56 = vadd.f32 %v1101_v55, %v1032_v43  ;;  %v1103_v57 = vpop.f32.mrb[26].mxu0  ;;  %v1408_v43 = vrot.slane %v307_v18, %v1407_v28 }
 0x19f   : > { %v1104_v58 = vpop.f32.mrb[27].mxu0 }
 0x1a0   : > { %v1140_v59 = vpop.f32.mrb[24].mxu1  ;;  %v309_v58 = vld [vmem:[%s3520_s5] sm:$0xff] }
 0x1a1   : > { %v1149_v60 = vadd.f32 %v1140_v59, %v1033_v48  ;;  %v1142_v61 = vpop.f32.mrb[25].mxu1  ;;  %v306_v59 = vld [vmem:[%s3522_s7] sm:$0xff] }
 0x1a2   : > { %v1150_v62 = vadd.f32 %v1142_v61, %v1034_v50  ;;  %v1144_v63 = vpop.f32.mrb[26].mxu1 }
 0x1a3   : > { %v1145_v1 = vpop.f32.mrb[27].mxu1 }
 0x1a8   : > { %v1215_v3 = vpop.f32.mrb[28].mxu0 }
 0x1a9   : > { %v1263_v4 = vadd.f32 %v1215_v3, %v1147_v54  ;;  %v1217_v5 = vpop.f32.mrb[29].mxu0  ;;  %v2568_v3 = vld [vmem:[%s3519_s4 + $0x4] sm:$0xf] }
 0x1aa   : > { %v1264_v6 = vadd.f32 %v1217_v5, %v1148_v56  ;;  %v1219_v7 = vpop.f32.mrb[30].mxu0 }
 0x1ab   : > { %v1220_v8 = vpop.f32.mrb[31].mxu0 }
 0x1ac   : > { %v1256_v10 = vpop.f32.mrb[28].mxu1 }
 0x1ad   : > { %v1265_v11 = vadd.f32 %v1256_v10, %v1149_v60  ;;  %v1258_v12 = vpop.f32.mrb[29].mxu1 }
 0x1ae   : > { %v1266_v13 = vadd.f32 %v1258_v12, %v1150_v62  ;;  %v1260_v14 = vpop.f32.mrb[30].mxu1 }
 0x1af   : > { %v1261_v15 = vpop.f32.mrb[31].mxu1 }
 0x1b0   : > { %v1331_v17 = vpop.f32.mrb[32].mxu0 }
 0x1b1   : > { %v1379_v20 = vadd.f32 %v1331_v17, %v1263_v4  ;;  %v1333_v21 = vpop.f32.mrb[33].mxu0 }
 0x1b2   : > { %v1380_v23 = vadd.f32 %v1333_v21, %v1264_v6  ;;  %v1335_v24 = vpop.f32.mrb[34].mxu0 }
 0x1b3   : > { %v1388_v26 = vadd.f32 %v1386_v19, %v1379_v20  ;;  %v1336_v27 = vpop.f32.mrb[35].mxu0 }
 0x1b4   : > { %v1389_v29 = vadd.f32 %v1386_v19, %v1380_v23  ;;  %v1372_v30 = vpop.f32.mrb[32].mxu1 }
 0x1b5   : > { %v1392_v32 = vmax.f32 %v1388_v26, 0.0  ;;  %v1381_v33 = vadd.f32 %v1372_v30, %v1265_v11  ;;  %v1374_v34 = vpop.f32.mrb[33].mxu1  ;;  %v2569_v26 = vld [vmem:[%s3519_s4 + $0x8] sm:$0xf] }
 0x1b6   : > { %v1393_v36 = vmax.f32 %v1389_v29, 0.0  ;;  %v1382_v39 = vadd.f32 %v1374_v34, %v1266_v13  ;;  %v1376_v40 = vpop.f32.mrb[34].mxu1 }
 0x1b7   : > { %v1417_v41 = vmul.f32 %v1400_v25, %v1392_v32  ;;  %v1390_v42 = vadd.f32 %v1386_v19, %v1381_v33  ;;  %v1377_v45 = vpop.f32.mrb[35].mxu1 }
 0x1b8   : > { %v1391_v46 = vadd.f32 %v1386_v19, %v1382_v39  ;;  %v1418_v48 = vmul.f32 %v1404_v31, %v1393_v36  ;;  %v2570_v36 = vld [vmem:[%s3519_s4 + $0xc] sm:$0xf] }
 0x1b9   : > { %v1421_v49 = vpack.c.bf16 %v1417_v41, %v1417_v41  ;;  %v1394_v50 = vmax.f32 %v1390_v42, 0.0 }
 0x1ba   : > { %v1395_v52 = vmax.f32 %v1391_v46, 0.0  ;;  %v1422_v54 = vpack.c.bf16 %v1418_v48, %v1418_v48 }
 0x1bb   : > { %v1419_v53 = vmul.f32 %v1408_v43, %v1394_v50  ;;  %1429 = vrot.lane.b32.xlu1 %v1421_v49, %s2933_s22  ;;  %v1537_v8 = vsel %vm379_vm1, %v1421_v49, 0  ;;  %v2571_v50 = vld [vmem:[%s3519_s4 + $0x10] sm:$0xf] }
 0x1bc   : > { %v1420_v56 = vmul.f32 %v1412_v51, %v1395_v52 }
 0x1bd   : > { %v3279_v55 = vpack.c.bf16 %v1419_v53, %v1419_v53 }
 0x1be   : > { %v1424_v57 = vpack.c.bf16 %v1420_v56, %v1420_v56 }
 0x1bf   : > { %1433 = vrot.lane.b32.xlu0 %v3279_v55, %s2933_s22  ;;  %1431 = vrot.lane.b32.xlu1 %v1422_v54, %s2933_s22  ;;  %v1543_v12 = vsel %vm379_vm1, %v3279_v55, 0 }
 0x1c3   : > { %1626 = vrot.lane.b32.xlu0 %v1421_v49, %s2934_s23  ;;  %1435 = vrot.lane.b32.xlu1 %v1424_v57, %s2933_s22  ;;  %s2810_s22 = smul.u32 384, %s3010_s9  ;;  %s2482_s9 = scalar_lea.sflag [#allocation3], %s296_s17 }
 0x1c7   : > { %1630 = vrot.lane.b32.xlu0 %v3279_v55, %s2934_s23  ;;  %1628 = vrot.lane.b32.xlu1 %v1422_v54, %s2934_s23 }
 0x1cb   : > { %1733 = vrot.lane.b32.xlu0 %v1421_v49, %s2935_s24  ;;  %1632 = vrot.lane.b32.xlu1 %v1424_v57, %s2934_s23  ;;  %s298_s23 = scalar_lea.vmem [#allocation2], %s2808_s18 }
 0x1cf   : > { %1737 = vrot.lane.b32.xlu0 %v3279_v55, %s2935_s24  ;;  %1735 = vrot.lane.b32.xlu1 %v1422_v54, %s2935_s24 }
 0x1d3   : > { %1840 = vrot.lane.b32.xlu0 %v1421_v49, %s2936_s25  ;;  %1739 = vrot.lane.b32.xlu1 %v1424_v57, %s2935_s24  ;;  %s2496_s24 = sshll.u32 %s298_s23, 4  ;;  %s3475_s24 = int_to_ptr.vmem [resolvable:$true] %s2496_s24 }
 0x1d7   : > { %1844 = vrot.lane.b32.xlu0 %v3279_v55, %s2936_s25  ;;  %1842 = vrot.lane.b32.xlu1 %v1422_v54, %s2936_s25 }
 0x1db   : > { %1947 = vrot.lane.b32.xlu0 %v1421_v49, %s2937_s26  ;;  %1846 = vrot.lane.b32.xlu1 %v1424_v57, %s2936_s25 }
 0x1df   : > { %1951 = vrot.lane.b32.xlu0 %v3279_v55, %s2937_s26  ;;  %1949 = vrot.lane.b32.xlu1 %v1422_v54, %s2937_s26 }
 0x1e3   : > { %2054 = vrot.lane.b32.xlu0 %v1421_v49, %s2938_s10  ;;  %1953 = vrot.lane.b32.xlu1 %v1424_v57, %s2937_s26 }
 0x1e7   : > { %2058 = vrot.lane.b32.xlu0 %v3279_v55, %s2938_s10  ;;  %2056 = vrot.lane.b32.xlu1 %v1422_v54, %s2938_s10 }
 0x1eb   : > { %2161 = vrot.lane.b32.xlu0 %v1421_v49, %s2939_s12  ;;  %2060 = vrot.lane.b32.xlu1 %v1424_v57, %s2938_s10  ;;  %s3473_s10 = scalar_lea.hbm %s3523_s8, %s2810_s22 }
 0x1ef   : > { %2165 = vrot.lane.b32.xlu0 %v3279_v55, %s2939_s12  ;;  %2163 = vrot.lane.b32.xlu1 %v1422_v54, %s2939_s12 }
 0x1f3   : > { %2268 = vrot.lane.b32.xlu0 %v1421_v49, %s2940_s13  ;;  %2167 = vrot.lane.b32.xlu1 %v1424_v57, %s2939_s12  ;;  %s2868_s12 = scalar_lea.vmem %s3475_s24, 384 }
 0x1f4   : > { %p2869_p11 = scmp.ne.s32.totalorder %s3475_s24, %s2868_s12 }
 0x1f6   : > { %p2870_p12 = pnand %p2869_p11, %p3027_p5 }
 0x1f7   : > { %2272 = vrot.lane.b32.xlu0 %v3279_v55, %s2940_s13  ;;  %2270 = vrot.lane.b32.xlu1 %v1422_v54, %s2940_s13 }
 0x1f8   : > { %p2871_p13 = pneg %p2870_p12 }
 0x1fb   : > { %2377 = vperm.xlu0 %2861, %v309_v58   ;;  %2274 = vrot.lane.b32.xlu1 %v1424_v57, %s2940_s13  ;;  %s2943_s13 = smov [#allocation2]  }
 0x1fc   : > { %s2872_s19 = sshll.u32 %s2943_s13, 4  ;;  %s2873_s19 = int_to_ptr.vmem [resolvable:$false] %s2872_s19 }
 0x1fd   : > { %s2874_s20 = scalar_lea.vmem %s2873_s19, 768  ;;  %p2875_p0 = scmp.lt.s32.totalorder %s3475_s24, %s2873_s19 }
 0x1fe   : > { %p2876_p1 = scmp.lt.s32.totalorder %s2874_s20, %s2868_s12 }
 0x1ff   : > { %2385 = vperm.xlu1 %2862, %v306_v59  }
 0x200   : > { %p2877_p2 = por %p2876_p1, %p2875_p0 }
 0x202   : > { %p2878_p3 = pnand %p2877_p2, %p2871_p13 }
 0x22d   : > { %v1430_v60 = vpop.permute.xlu1 %1429 }
 0x231   : > { %v1434_v61 = vpop.permute.xlu0 %1433  ;;  %v1432_v62 = vpop.permute.xlu1 %1431 }
 0x232   : > { %v1437_v63 = vsel %vm370_vm0, %v1430_v60, %v1432_v62  ;;  %v1438_v1 = vsel %vm370_vm0, %v1432_v62, %v1434_v61  ;;  %v2572_v60 = vld [vmem:[%s3519_s4 + $0x14] sm:$0xf] }
 0x233   : > { %v1444_v2 = vsel %vm379_vm1, %v1437_v63, 0  ;;  %2617 = vmatprep.subr.msk.bf16.mxu0 %vm379_vm1, %v1438_v1 }
 0x234   : > { %1453 = vmatpush1.bf16.msra.mxu0 %v1444_v2 }
 0x235   : > { %v1627_v4 = vpop.permute.xlu0 %1626  ;;  %2620 = vmatprep.subr.msk.bf16.mxu0 %vm379_vm1, %v1422_v54  ;;  %v1436_v5 = vpop.permute.xlu1 %1435 }
 0x236   : > { %v1439_v6 = vsel %vm370_vm0, %v1434_v61, %v1436_v5 }
 0x237   : > { %v1450_v7 = vsel %vm379_vm1, %v1439_v6, 0  ;;  %2618 = vmatmul.mubr.msk.bf16.vlgmr.msra.gmra.mrb[36].mxu0 %vm375_vm2, %v2568_v3 }
 0x238   : > { %2671 = vmatpush3.bf16.msra.mxu1 %v1450_v7  ;;  %1546 = vmatpush1.bf16.msra.mxu0 %v1537_v8  ;;  %v2573_v7 = vld [vmem:[%s3519_s4 + $0x18] sm:$0xf] }
 0x239   : > { %v1631_v9 = vpop.permute.xlu0 %1630  ;;  %v1629_v10 = vpop.permute.xlu1 %1628  ;;  %2676 = vmatprep.subr.bf16.mxu1 %v2941_v47  ;;  %1577 = vmatprep.mubr.bf16.mxu0 %v2932_v0 }
 0x23a   : > { %v1635_v11 = vsel %vm581_vm3, %v1629_v10, %v1631_v9  ;;  %v1634_v15 = vsel %vm581_vm3, %v1627_v4, %v1629_v10 }
 0x23b   : > { %2673 = vmatmul.mubr.msk.bf16.vlgmr.msra.gmra.mrb[36].mxu1 %vm375_vm2, %v2568_v3  ;;  %2623 = vmatprep.subr.msk.bf16.mxu0 %vm379_vm1, %v1635_v11  ;;  %v1641_v20 = vsel %vm379_vm1, %v1634_v15, 0  ;;  %v2574_v15 = vld [vmem:[%s3519_s4 + $0x1c] sm:$0xf] }
 0x23c   : > { %2677 = vmatpush3.bf16.msra.mxu1 %v1543_v12  ;;  %2678 = vmatprep.mubr.msk.bf16.mxu1 %vm2942_vm10, %v2941_v47 }
 0x23d   : > { %v1734_v13 = vpop.permute.xlu0 %1733  ;;  %v1633_v14 = vpop.permute.xlu1 %1632  ;;  %2682 = vmatprep.subr.bf16.mxu1 %v2941_v47 }
 0x23e   : > { %v1636_v21 = vsel %vm581_vm3, %v1631_v9, %v1633_v14 }
 0x23f   : > { %v1647_v22 = vsel %vm379_vm1, %v1636_v21, 0 }
 0x241   : > { %v1738_v17 = vpop.permute.xlu0 %1737  ;;  %v1736_v18 = vpop.permute.xlu1 %1735 }
 0x242   : > { %v1742_v19 = vsel %vm697_vm4, %v1736_v18, %v1738_v17  ;;  %v1741_v25 = vsel %vm697_vm4, %v1734_v13, %v1736_v18 }
 0x243   : > { %2621 = vmatmul.mubr.msk.bf16.vlgmr.msra.gmra.mrb[36].mxu0 %vm375_vm2, %v327_v16  ;;  %v1748_v29 = vsel %vm379_vm1, %v1741_v25, 0 }
 0x244   : > { %1650 = vmatpush1.bf16.msra.mxu0 %v1641_v20  ;;  %1681 = vmatprep.mubr.bf16.mxu0 %v2932_v0  ;;  %v2575_v20 = vld [vmem:[%s3519_s4 + $0x20] sm:$0xf] }
 0x245   : > { %2626 = vmatprep.subr.msk.bf16.mxu0 %vm379_vm1, %v1742_v19  ;;  %v1841_v23 = vpop.permute.xlu0 %1840  ;;  %v1740_v24 = vpop.permute.xlu1 %1739 }
 0x246   : > { %v1743_v30 = vsel %vm697_vm4, %v1738_v17, %v1740_v24 }
 0x247   : > { %2679 = vmatmul.mubr.msk.bf16.vlgmr.msra.gmra.mrb[36].mxu1 %vm375_vm2, %v327_v16  ;;  %v1754_v32 = vsel %vm379_vm1, %v1743_v30, 0 }
 0x248   : > { %2683 = vmatpush3.bf16.msra.mxu1 %v1647_v22  ;;  %2684 = vmatprep.mubr.msk.bf16.mxu1 %vm2942_vm10, %v2941_v47 }
 0x249   : > { %2688 = vmatprep.subr.bf16.mxu1 %v2941_v47  ;;  %v1845_v27 = vpop.permute.xlu0 %1844  ;;  %v1843_v28 = vpop.permute.xlu1 %1842 }
 0x24a   : > { %v1849_v31 = vsel %vm813_vm5, %v1843_v28, %v1845_v27  ;;  %v1848_v35 = vsel %vm813_vm5, %v1841_v23, %v1843_v28 }
 0x24b   : > { %v1855_v41 = vsel %vm379_vm1, %v1848_v35, 0 }
 0x24d   : > { %v1948_v33 = vpop.permute.xlu0 %1947  ;;  %v1847_v34 = vpop.permute.xlu1 %1846 }
 0x24e   : > { %v1850_v42 = vsel %vm813_vm5, %v1845_v27, %v1847_v34 }
 0x24f   : > { %2624 = vmatmul.mubr.msk.bf16.vlgmr.msra.gmra.mrb[36].mxu0 %vm375_vm2, %v2569_v26  ;;  %v1861_v45 = vsel %vm379_vm1, %v1850_v42, 0 }
 0x250   : > { %1757 = vmatpush1.bf16.msra.mxu0 %v1748_v29  ;;  %1788 = vmatprep.mubr.bf16.mxu0 %v2932_v0 }
 0x251   : > { %2629 = vmatprep.subr.msk.bf16.mxu0 %vm379_vm1, %v1849_v31  ;;  %v1952_v39 = vpop.permute.xlu0 %1951  ;;  %v1950_v40 = vpop.permute.xlu1 %1949 }
 0x252   : > { %v1956_v43 = vsel %vm929_vm6, %v1950_v40, %v1952_v39  ;;  %v1955_v49 = vsel %vm929_vm6, %v1948_v33, %v1950_v40 }
 0x253   : > { %2685 = vmatmul.mubr.msk.bf16.vlgmr.msra.gmra.mrb[36].mxu1 %vm375_vm2, %v2569_v26  ;;  %v1962_v53 = vsel %vm379_vm1, %v1955_v49, 0 }
 0x254   : > { %2689 = vmatpush3.bf16.msra.mxu1 %v1754_v32  ;;  %2690 = vmatprep.mubr.msk.bf16.mxu1 %vm2942_vm10, %v2941_v47 }
 0x255   : > { %2694 = vmatprep.subr.bf16.mxu1 %v2941_v47  ;;  %v2055_v46 = vpop.permute.xlu0 %2054  ;;  %v1954_v48 = vpop.permute.xlu1 %1953 }
 0x256   : > { %v1957_v54 = vsel %vm929_vm6, %v1952_v39, %v1954_v48 }
 0x257   : > { %v1968_v56 = vsel %vm379_vm1, %v1957_v54, 0 }
 0x259   : > { %v2059_v51 = vpop.permute.xlu0 %2058  ;;  %v2057_v52 = vpop.permute.xlu1 %2056 }
 0x25a   : > { %v2063_v55 = vsel %vm1045_vm7, %v2057_v52, %v2059_v51  ;;  %v2062_v59 = vsel %vm1045_vm7, %v2055_v46, %v2057_v52 }
 0x25b   : > { %2627 = vmatmul.mubr.msk.bf16.vlgmr.msra.gmra.mrb[36].mxu0 %vm375_vm2, %v2570_v36  ;;  %v2069_v63 = vsel %vm379_vm1, %v2062_v59, 0 }
 0x25c   : > { %1864 = vmatpush1.bf16.msra.mxu0 %v1855_v41  ;;  %1895 = vmatprep.mubr.bf16.mxu0 %v2932_v0 }
 0x25d   : > { %2632 = vmatprep.subr.msk.bf16.mxu0 %vm379_vm1, %v1956_v43  ;;  %v2162_v57 = vpop.permute.xlu0 %2161  ;;  %v2061_v58 = vpop.permute.xlu1 %2060 }
 0x25e   : > { %v2064_v1 = vsel %vm1045_vm7, %v2059_v51, %v2061_v58 }
 0x25f   : > { %2691 = vmatmul.mubr.msk.bf16.vlgmr.msra.gmra.mrb[36].mxu1 %vm375_vm2, %v2570_v36  ;;  %v2075_v3 = vsel %vm379_vm1, %v2064_v1, 0 }
 0x260   : > { %2695 = vmatpush3.bf16.msra.mxu1 %v1861_v45  ;;  %2696 = vmatprep.mubr.msk.bf16.mxu1 %vm2942_vm10, %v2941_v47 }
 0x261   : > { %2700 = vmatprep.subr.bf16.mxu1 %v2941_v47  ;;  %v2166_v61 = vpop.permute.xlu0 %2165  ;;  %v2164_v62 = vpop.permute.xlu1 %2163 }
 0x262   : > { %v2170_v2 = vsel %vm1161_vm8, %v2164_v62, %v2166_v61  ;;  %v2169_v6 = vsel %vm1161_vm8, %v2162_v57, %v2164_v62 }
 0x263   : > { %v2176_v10 = vsel %vm379_vm1, %v2169_v6, 0 }
 0x265   : > { %v2269_v4 = vpop.permute.xlu0 %2268  ;;  %v2168_v5 = vpop.permute.xlu1 %2167 }
 0x266   : > { %v2171_v11 = vsel %vm1161_vm8, %v2166_v61, %v2168_v5 }
 0x267   : > { %2630 = vmatmul.mubr.msk.bf16.vlgmr.msra.gmra.mrb[36].mxu0 %vm375_vm2, %v2571_v50  ;;  %v2182_v13 = vsel %vm379_vm1, %v2171_v11, 0 }
 0x268   : > { %1971 = vmatpush1.bf16.msra.mxu0 %v1962_v53  ;;  %2002 = vmatprep.mubr.bf16.mxu0 %v2932_v0 }
 0x269   : > { %2635 = vmatprep.subr.msk.bf16.mxu0 %vm379_vm1, %v2063_v55  ;;  %v2273_v8 = vpop.permute.xlu0 %2272  ;;  %v2271_v9 = vpop.permute.xlu1 %2270 }
 0x26a   : > { %v2277_v12 = vsel %vm1277_vm9, %v2271_v9, %v2273_v8  ;;  %v2276_v14 = vsel %vm1277_vm9, %v2269_v4, %v2271_v9 }
 0x26b   : > { %2697 = vmatmul.mubr.msk.bf16.vlgmr.msra.gmra.mrb[36].mxu1 %vm375_vm2, %v2571_v50  ;;  %v2283_v17 = vsel %vm379_vm1, %v2276_v14, 0 }
 0x26c   : > { %2701 = vmatpush3.bf16.msra.mxu1 %v1968_v56  ;;  %2702 = vmatprep.mubr.msk.bf16.mxu1 %vm2942_vm10, %v2941_v47 }
 0x26d   : > { %2706 = vmatprep.subr.bf16.mxu1 %v2941_v47  ;;  %v2275_v16 = vpop.permute.xlu1 %2274 }
 0x26e   : > { %v2278_v18 = vsel %vm1277_vm9, %v2273_v8, %v2275_v16 }
 0x26f   : > { %v2289_v19 = vsel %vm379_vm1, %v2278_v18, 0 }
 0x273   : > { %2633 = vmatmul.mubr.msk.bf16.vlgmr.msra.gmra.mrb[36].mxu0 %vm375_vm2, %v2572_v60 }
 0x274   : > { %2078 = vmatpush1.bf16.msra.mxu0 %v2069_v63  ;;  %2109 = vmatprep.mubr.bf16.mxu0 %v2932_v0 }
 0x275   : > { %2638 = vmatprep.subr.msk.bf16.mxu0 %vm379_vm1, %v2170_v2 }
 0x277   : > { %2703 = vmatmul.mubr.msk.bf16.vlgmr.msra.gmra.mrb[36].mxu1 %vm375_vm2, %v2572_v60 }
 0x278   : > { %2707 = vmatpush3.bf16.msra.mxu1 %v2075_v3  ;;  %2708 = vmatprep.mubr.msk.bf16.mxu1 %vm2942_vm10, %v2941_v47 }
 0x279   : > { %2712 = vmatprep.subr.bf16.mxu1 %v2941_v47 }
 0x27a   : > { %v2378_v21 = vpop.permute.xlu0 %2377 }
 0x27f   : > { %2636 = vmatmul.mubr.msk.bf16.vlgmr.msra.gmra.mrb[36].mxu0 %vm375_vm2, %v2573_v7 }
 0x280   : > { %2185 = vmatpush1.bf16.msra.mxu0 %v2176_v10  ;;  %2216 = vmatprep.mubr.bf16.mxu0 %v2932_v0 }
 0x281   : > { %2641 = vmatprep.subr.msk.bf16.mxu0 %vm379_vm1, %v2277_v12 }
 0x283   : > { %2709 = vmatmul.mubr.msk.bf16.vlgmr.msra.gmra.mrb[36].mxu1 %vm375_vm2, %v2573_v7 }
 0x284   : > { %2713 = vmatpush3.bf16.msra.mxu1 %v2182_v13  ;;  %2714 = vmatprep.mubr.msk.bf16.mxu1 %vm2942_vm10, %v2941_v47 }
 0x285   : > { %2718 = vmatprep.subr.bf16.mxu1 %v2941_v47 }
 0x28b   : > { %2639 = vmatmul.mubr.msk.bf16.vlgmr.msra.gmra.mrb[36].mxu0 %vm375_vm2, %v2574_v15 }
 0x28c   : > { %2292 = vmatpush1.bf16.msra.mxu0 %v2283_v17  ;;  %2323 = vmatprep.mubr.bf16.mxu0 %v2932_v0 }
 0x28d   : > { %2644 = vmatprep.subr.msk.bf16.mxu0 %vm379_vm1, %v3249_v37  ;;  %v305_v37 = vld [vmem:[%s3521_s6] sm:$0xf] }
 0x28f   : > { %2715 = vmatmul.mubr.msk.bf16.vlgmr.msra.gmra.mrb[36].mxu1 %vm375_vm2, %v2574_v15 }
 0x290   : > { %2719 = vmatpush3.bf16.msra.mxu1 %v2289_v19  ;;  %2720 = vmatprep.mubr.msk.bf16.mxu1 %vm2942_vm10, %v2941_v47 }
 0x291   : > { %2724 = vmatprep.subr.bf16.mxu1 %v2941_v47 }
 0x297   : > { %2642 = vmatmul.mubr.msk.bf16.vlgmr.msra.gmra.mrb[36].mxu0 %vm375_vm2, %v2575_v20 }
 0x298   : > { %2392 = vmatpush1.bf16.msra.mxu0 %v3252_v38  ;;  %2423 = vmatprep.mubr.bf16.mxu0 %v2932_v0  ;;  %v2386_v38 = vpop.permute.xlu1 %2385 }
 0x299   : > { %v2730_v0 = vadd.f32 %v2386_v38, %v2378_v21 }
 0x29b   : > { %2721 = vmatmul.mubr.msk.bf16.vlgmr.msra.gmra.mrb[36].mxu1 %vm375_vm2, %v2575_v20 }
 0x29c   : > { %2725 = vmatpush3.bf16.msra.mxu1 %v3265_v44  ;;  %2726 = vmatprep.mubr.msk.bf16.mxu1 %vm2942_vm10, %v2941_v47 }
 0x2a3   : > { %2645 = vmatmul.mubr.msk.bf16.vlgmr.msra.gmra.mrb[36].mxu0 %vm375_vm2, %v305_v37 }
 0x2a7   : > { %2727 = vmatmul.mubr.msk.bf16.vlgmr.msra.gmra.mrb[36].mxu1 %vm375_vm2, %v305_v37 }
 0x376   : > { %v2425_v22 = vpop.f32.mrb[36].mxu0 }
 0x377   : > { %v2731_v23 = vadd.f32 %v2730_v0, %v2425_v22  ;;  %v2427_v44 = vpop.f32.mrb[37].mxu0 }
 0x378   : > { %v2733_v24 = vadd.f32 %v2730_v0, %v2427_v44  ;;  %v2429_v25 = vpop.f32.mrb[38].mxu0 }
 0x379   : > { %v2475_v47 = vmax.f32 %v2731_v23, 0.0  ;;  %v2430_v26 = vpop.f32.mrb[39].mxu0 }
 0x37a   : > { %v2476_v27 = vmax.f32 %v2733_v24, 0.0  ;;  %v2466_v28 = vpop.f32.mrb[36].mxu1 }
 0x37b   : > { %2478 = vst [vmem:[%s298_s23] sm:$0xff] %v2475_v47  ;;  %v2735_v29 = vadd.f32 %v2730_v0, %v2466_v28  ;;  %v2728_v30 = vpop.f32.mrb[37].mxu1 }
 0x37c   : > { %2479 = vst [vmem:[%s298_s23 + $0x8] sm:$0xff] %v2476_v27  ;;  %v2469_v31 = vpop.f32.mrb[38].mxu1 }
 0x37d   : > { %v2477_v32 = vmax.f32 %v2735_v29, 0.0  ;;  %v2729_v33 = vpop.f32.mrb[39].mxu1 }
 0x37f   : > { %2480 = vst [vmem:[%s298_s23 + $0x10] sm:$0xff] %v2477_v32 }
 0x380   : > { %2881 = shalt.err (!%p2878_p3)
}
 0x381   : > { %s2882_s21 = scalar_lea.hbm %s3473_s10, 384  ;;  %s2886_s22 = scalar_lea.hbm %s3523_s8, 768 }
 0x382   : > { %p2883_p4 = scmp.ne.s32.totalorder %s3473_s10, %s2882_s21  ;;  %p2887_p9 = scmp.lt.u32.totalorder %s3473_s10, %s3523_s8 }
 0x383   : > { %p2888_p10 = scmp.lt.u32.totalorder %s2886_s22, %s2882_s21  ;;  %p2890_p12 = scmp.lt.u32.totalorder %s2882_s21, %s3473_s10 }
 0x384   : > { %p2884_p7 = pnand %p2883_p4, %p3027_p5 }
 0x385   : > { %p2889_p11 = por %p2888_p10, %p2887_p9 }
 0x386   : > { %p2885_p8 = pneg %p2884_p7 }
 0x387   : > { %p2891_p13 = por %p2890_p12, %p2889_p11 }
 0x389   : > { %p2892_p0 = pnand %p2891_p13, %p2885_p8 }
 0x38b   : > { %2895 = shalt.err (!%p2892_p0)
}
 0x38c   : > { %2811 = dma.vmem_to_hbm [thread:$0]  (%p3027_p5), %s3475_s24, 384, %s3473_s10, %s2482_s9  }
 0x38d PF: > { %p2817_p1 = scmp.ge.s32.totalorder %s2930_s30, 2  ;;  %s2508_s26 = sand.u32 1, %s2918_s27  }
 0x38e   : > { %s2509_s12 = scalar_lea.sflag [#allocation3], %s2508_s26 }
 0x38f   : > { %p2814_p2 = pnand %p2817_p1, %p3031_p6 }
 0x391   : > { %2913 = dma.done.wait (!%p2814_p2), %s2509_s12, 384  }
 0x392   : > { %2915 = vsyncadd (!%p2814_p2), %s2509_s12, 4294966912  ;;  %p18_p3 = scmp.ge.s32.totalorder %s3014_s11, 4   ;;  %s3526_s27 = smov %s2922_s28 }
 0x393   : > { %s3527_s28 = smov %s2926_s29  ;;  %s3528_s29 = smov %s3025_s14 }
 0x394   : > { %s3529_s30 = smov %s3014_s11  ;;  %20 = sbr.rel (!%p18_p3) target bundleno = 3 (0x3), region = 103 }
 0x39b   :  { %2514 = vsyncpa [#allocation3], 1 }
 0x39c   :  { %2516 = vsyncpa [#allocation3 + $0x1], 1 }

</bundles_post_ra>
